<compile_context>
chip_gen: v6e
topology: v6e:2x2x1
jax: 0.10.0
libtpu: 0.0.40
codegen_flags: <defaults>
</compile_context>

<pallas_src>
import functools

import jax
import jax.numpy as jnp
from jax import lax
from jax.experimental import pallas as pl
from jax.experimental.pallas import tpu as pltpu


# ----------------------------------------------------------------------------- helpers
def _round_up(x, m):
    return (x + m - 1) // m * m


def _mult8_divisor_leq(n, target):
    """Largest multiple of 8 that divides n and is <= target (n is a multiple of 8)."""
    d = min(n, target) // 8 * 8
    while d >= 8:
        if n % d == 0:
            return d
        d -= 8
    return 8


def _pick_time_chunk(t):
    """Time-chunk Tc (8..16) and padded length Tp (multiple of Tc)."""
    for c in (16, 8):
        if t % c == 0:
            return c, t
    c = min(8, t)
    return c, _round_up(t, c)


def _vmem_limit(*block_bytes):
    """Scoped-VMEM limit from actual block sizes (x2 for double buffering) + headroom."""
    need = 2 * sum(int(b) for b in block_bytes) + (4 << 20)
    return int(min(max(need, 32 << 20), 96 << 20))


# ----------------------------------------------------------------------------- kernel A: batched input projection
def input_proj_kernel(x_ref, w_ref, b_ref, gi_ref):
    """gi = x @ W_ih^T + (b_ih + b_hh folded for r/z gates).

    x : (tm, E) bf16    w : (E, 3Hp) bf16    b : (1, 3Hp) f32    gi : (tm, 3Hp) f32
    """
    gi_ref[...] = jnp.dot(x_ref[...], w_ref[...],
                          preferred_element_type=jnp.float32) + b_ref[...]


# ----------------------------------------------------------------------------- kernel B: time-chunked GRU recurrence
def gru_recurrence_kernel(gi_ref, w_hh_ref, b_hn_ref, h0_ref, hs_ref, hN_ref,
                          *, hp, tc, t_valid):
    """One grid step == Tc GRU time steps (serial recurrence => 'arbitrary' axis).

    gi_ref  : (Tc, Bp, 3Hp) f32   precomputed input projection (biases folded)
    w_hh_ref: (Hp, 3Hp)     bf16  pre-transposed hidden weights
    b_hn_ref: (1, Hp)       f32   hidden bias of the n-gate
    h0_ref  : (Bp, Hp)      f32   initial hidden
    hs_ref  : (Tc, Bp, Hp)  bf16  hidden states for this chunk (bf16 halves HBM writeback)
    hN_ref  : (Bp, Hp)      f32   resident output block == carried hidden state
    t_valid : None (no time padding) or real T (tail guard for padded steps)
    """
    @pl.when(pl.program_id(0) == 0)
    def _():
        hN_ref[...] = h0_ref[...]

    w_hh = w_hh_ref[...]            # hoisted: loaded once per chunk
    b_hn = b_hn_ref[...]
    chunk0 = pl.program_id(0) * tc

    # TODO(synk): on v6e/v7x, pin w_hh in the MXU via pltpu.matmul_push_rhs once per chunk
    # and split the batch over the two v7x TensorCores (grid=(Bp//tb, Tp//Tc), "parallel").
    def step(i, h):
        gi = gi_ref[i]                                           # (Bp, 3Hp)
        gh = jnp.dot(h.astype(jnp.bfloat16), w_hh,
                     preferred_element_type=jnp.float32)         # (Bp, 3Hp)
        # Hp is a multiple of 128 -> all gate slices are lane-aligned (no relayouts).
        r = jax.nn.sigmoid(gi[:, :hp] + gh[:, :hp])
        z = jax.nn.sigmoid(gi[:, hp:2 * hp] + gh[:, hp:2 * hp])
        n = jnp.tanh(gi[:, 2 * hp:] + r * (gh[:, 2 * hp:] + b_hn))
        h_new = (1.0 - z) * n + z * h
        hs_ref[i] = h_new.astype(jnp.bfloat16)
        if t_valid is not None:       # only emitted when T was padded to Tp
            h_new = jnp.where(chunk0 + i < t_valid, h_new, h)
        return h_new

    hN_ref[...] = lax.fori_loop(0, tc, step, hN_ref[...], unroll=True)


# ----------------------------------------------------------------------------- kernel C: output projection + log_softmax
def out_proj_kernel(h_ref, w_ref, b_ref, out_ref):
    """out = log_softmax(h @ W_out^T + b_out) over a lane-dense padded vocab.

    h : (tm, Hp) bf16   w : (Hp, Vp) bf16   b : (1, Vp) f32 (padded cols = -1e9)
    out : (tm, Vp) f32  (batch-major rows -> no big XLA transpose afterwards)
    """
    logits = jnp.dot(h_ref[...], w_ref[...],
                     preferred_element_type=jnp.float32) + b_ref[...]
    m = jnp.max(logits, axis=-1, keepdims=True)
    # TODO(synk): for realistically large V (>~8K) tile the vocab axis (two-pass LSE) —
    # mandatory on v7x's 64 MiB VMEM; and on v6e/v7x the exp could run in bf16 on the EUP.
    lse = jnp.log(jnp.sum(jnp.exp(logits - m), axis=-1, keepdims=True)) + m
    out_ref[...] = logits - lse


# ----------------------------------------------------------------------------- parameters
def init_params(key, voc_size, emb_size, hid_size):
    ks = jax.random.split(key, 7)
    s = 0.1
    return {
        "emb":   s * jax.random.normal(ks[0], (voc_size, emb_size), jnp.float32),
        "w_ih":  s * jax.random.normal(ks[1], (3 * hid_size, emb_size), jnp.float32),
        "w_hh":  s * jax.random.normal(ks[2], (3 * hid_size, hid_size), jnp.float32),
        "b_ih":  s * jax.random.normal(ks[3], (3 * hid_size,), jnp.float32),
        "b_hh":  s * jax.random.normal(ks[4], (3 * hid_size,), jnp.float32),
        "w_out": s * jax.random.normal(ks[5], (voc_size, hid_size), jnp.float32),
        "b_out": s * jax.random.normal(ks[6], (voc_size,), jnp.float32),
    }


# ----------------------------------------------------------------------------- forward
@jax.jit
def generator_forward(tokens, params, hidden=None):
    """Returns (log_probs (B, T, V), hidden (1, B, H)), matching Generator.forward."""
    B, T = tokens.shape
    V, E = params["emb"].shape
    H = params["w_hh"].shape[1]

    Bp = _round_up(B, 8)                    # sublane-aligned batch
    Hp = _round_up(H, 128)                  # lane-aligned hidden (gate slices stay aligned)
    Vp = _round_up(V, 128)                  # lane-dense padded vocab
    Tc, Tp = _pick_time_chunk(T)            # time chunk + padded time length
    M = Tp * Bp                             # rows for the batched projections
    tm = _mult8_divisor_leq(M, 512)         # row tile: multiple of 8, divides M
    GH3 = 3 * Hp
    H2 = 2 * H

    # ---- one-time weight prep: per-gate padded to Hp, pre-transposed, bf16, biases pre-summed ----
    def pad_gate_rows(w):                   # (3H, X) -> (3Hp, X)
        return jnp.concatenate(
            [jnp.pad(w[g * H:(g + 1) * H], ((0, Hp - H), (0, 0))) for g in range(3)], 0)

    def pad_gate_vec(v):                    # (H,) -> (Hp,)
        return jnp.pad(v, (0, Hp - H))

    w_ih_t = pad_gate_rows(params["w_ih"]).T.astype(jnp.bfloat16)             # (E, 3Hp)
    w_hh_t = jnp.pad(pad_gate_rows(params["w_hh"]),
                     ((0, 0), (0, Hp - H))).T.astype(jnp.bfloat16)            # (Hp, 3Hp)
    b_ih, b_hh = params["b_ih"], params["b_hh"]
    b_in = jnp.concatenate([pad_gate_vec(b_ih[:H] + b_hh[:H]),
                            pad_gate_vec(b_ih[H:H2] + b_hh[H:H2]),
                            pad_gate_vec(b_ih[H2:])]).reshape(1, GH3)
    b_hn = pad_gate_vec(b_hh[H2:]).reshape(1, Hp)
    w_out_t = jnp.zeros((Hp, Vp), jnp.bfloat16).at[:H, :V].set(
        params["w_out"].T.astype(jnp.bfloat16))                               # (Hp, Vp)
    b_out_p = jnp.full((1, Vp), -1e9, jnp.float32).at[0, :V].set(params["b_out"])

    # ---- embedding gather: bf16, time-major rows directly (no activation pad/transpose/cast) ----
    # TODO(synk): could be fully fused into kernel A via scalar-prefetch row gather.
    emb_tab = params["emb"].astype(jnp.bfloat16)
    tok = jnp.zeros((Bp, Tp), jnp.int32).at[:B, :T].set(tokens)
    emb_flat = emb_tab[tok.T.reshape(M)]                                      # (M, E) bf16

    if hidden is None:
        h0 = jnp.zeros((Bp, Hp), jnp.float32)
    else:
        h0 = jnp.zeros((Bp, Hp), jnp.float32).at[:B, :H].set(
            hidden.reshape(B, H).astype(jnp.float32))

    # ---- kernel A: batched input projection (parallel over rows) ----
    vmem_a = _vmem_limit(tm * E * 2, E * GH3 * 2, GH3 * 4, tm * GH3 * 4)
    gi = pl.pallas_call(
        input_proj_kernel,
        out_shape=jax.ShapeDtypeStruct((M, GH3), jnp.float32),
        grid_spec=pltpu.PrefetchScalarGridSpec(
            num_scalar_prefetch=0, grid=(M // tm,),
            in_specs=[pl.BlockSpec((tm, E), lambda i: (i, 0)),
                      pl.BlockSpec((E, GH3), lambda i: (0, 0)),
                      pl.BlockSpec((1, GH3), lambda i: (0, 0))],
            out_specs=pl.BlockSpec((tm, GH3), lambda i: (i, 0))),
        compiler_params=pltpu.CompilerParams(
            dimension_semantics=("parallel",), vmem_limit_bytes=vmem_a),
    )(emb_flat, w_ih_t, b_in)
    gi = gi.reshape(Tp, Bp, GH3)

    # ---- kernel B: serial recurrence over time chunks ----
    # TODO(synk): grid-invariant weight specs could use pipeline_mode=pl.Buffered(1) to halve
    # their VMEM footprint on v7x.
    t_valid = None if Tp == T else T
    vmem_b = _vmem_limit(Tc * Bp * GH3 * 4, Hp * GH3 * 2, Hp * 4,
                         Bp * Hp * 4, Tc * Bp * Hp * 2, Bp * Hp * 4)
    hs, h_n = pl.pallas_call(
        functools.partial(gru_recurrence_kernel, hp=Hp, tc=Tc, t_valid=t_valid),
        out_shape=(jax.ShapeDtypeStruct((Tp, Bp, Hp), jnp.bfloat16),
                   jax.ShapeDtypeStruct((Bp, Hp), jnp.float32)),
        grid_spec=pltpu.PrefetchScalarGridSpec(
            num_scalar_prefetch=0, grid=(Tp // Tc,),
            in_specs=[pl.BlockSpec((Tc, Bp, GH3), lambda c: (c, 0, 0)),
                      pl.BlockSpec((Hp, GH3), lambda c: (0, 0)),
                      pl.BlockSpec((1, Hp), lambda c: (0, 0)),
                      pl.BlockSpec((Bp, Hp), lambda c: (0, 0))],
            out_specs=[pl.BlockSpec((Tc, Bp, Hp), lambda c: (c, 0, 0)),
                       pl.BlockSpec((Bp, Hp), lambda c: (0, 0))]),
        compiler_params=pltpu.CompilerParams(
            dimension_semantics=("arbitrary",), vmem_limit_bytes=vmem_b),
    )(gi, w_hh_t, b_hn, h0)

    # ---- transpose the SMALL hs tensor to batch-major so kernel C's output needs no transpose ----
    hs_bm = jnp.transpose(hs, (1, 0, 2)).reshape(M, Hp)                       # (Bp*Tp, Hp) bf16

    # ---- kernel C: batched output projection + log_softmax (parallel over rows) ----
    vmem_c = _vmem_limit(tm * Hp * 2, Hp * Vp * 2, Vp * 4, tm * Vp * 4)
    log_probs_p = pl.pallas_call(
        out_proj_kernel,
        out_shape=jax.ShapeDtypeStruct((M, Vp), jnp.float32),
        grid_spec=pltpu.PrefetchScalarGridSpec(
            num_scalar_prefetch=0, grid=(M // tm,),
            in_specs=[pl.BlockSpec((tm, Hp), lambda i: (i, 0)),
                      pl.BlockSpec((Hp, Vp), lambda i: (0, 0)),
                      pl.BlockSpec((1, Vp), lambda i: (0, 0))],
            out_specs=pl.BlockSpec((tm, Vp), lambda i: (i, 0))),
        compiler_params=pltpu.CompilerParams(
            dimension_semantics=("parallel",), vmem_limit_bytes=vmem_c),
    )(hs_bm, w_out_t, b_out_p)

    # Output rows are already batch-major: reshape + slice only, no transpose of the big tensor.
    out = log_probs_p.reshape(Bp, Tp, Vp)[:B, :T, :V]                         # (B, T, V)
    return out, h_n[:B, :H][None]                                             # (1, B, H)


# ----------------------------------------------------------------------------- pure-JAX reference (PyTorch GRU semantics)
def reference_forward(tokens, params, hidden=None):
    B, T = tokens.shape
    H = params["w_hh"].shape[1]
    emb = params["emb"][tokens]                          # (B, T, E)
    h = jnp.zeros((B, H), jnp.float32) if hidden is None else hidden.reshape(B, H)

    def step(h, x_t):
        gi = x_t @ params["w_ih"].T + params["b_ih"]
        gh = h @ params["w_hh"].T + params["b_hh"]
        r = jax.nn.sigmoid(gi[:, :H] + gh[:, :H])
        z = jax.nn.sigmoid(gi[:, H:2 * H] + gh[:, H:2 * H])
        n = jnp.tanh(gi[:, 2 * H:] + r * gh[:, 2 * H:])
        h_new = (1.0 - z) * n + z * h
        return h_new, h_new

    h_n, hs = jax.lax.scan(step, h, jnp.transpose(emb, (1, 0, 2)))
    hs = jnp.transpose(hs, (1, 0, 2))                    # (B, T, H)
    logits = hs @ params["w_out"].T + params["b_out"]
    return jax.nn.log_softmax(logits, -1), h_n[None]


# ----------------------------------------------------------------------------- main
if __name__ == "__main__":
    # TODO(synk): rand_sample/roll_out/beam_sample use torch.multinomial sampling loops;
    # only the forward pass (embedding -> GRU -> Linear -> log_softmax) is implemented here.
    VOC, EMB, HID = 32, 16, 32
    B, T = 4, 8

    key = jax.random.PRNGKey(0)
    pkey, tkey = jax.random.split(key)
    params = init_params(pkey, VOC, EMB, HID)
    tokens = jax.random.randint(tkey, (B, T), 0, VOC, dtype=jnp.int32)

    log_probs, hidden = generator_forward(tokens, params)
    log_probs = jax.block_until_ready(log_probs)
    hidden = jax.block_until_ready(hidden)

    ref_lp, ref_h = reference_forward(tokens, params)

    assert log_probs.shape == (B, T, VOC)
    assert hidden.shape == (1, B, HID)
    # bf16 MXU operands with f32 accumulation -> relaxed tolerance vs the f32 reference.
    # (Note: the bf16-per-step hidden cast drifts more at production T; verify tolerance there.)
    assert jnp.allclose(log_probs, ref_lp, atol=2e-2, rtol=2e-2)
    assert jnp.allclose(hidden, ref_h, atol=2e-2, rtol=2e-2)
    # log_softmax rows must sum to 1 in prob space
    assert jnp.allclose(jnp.sum(jnp.exp(log_probs), -1), 1.0, atol=1e-4)

    print("KERNEL_OK")
</pallas_src>

<mosaic_0001>
module attributes {stable_mosaic.version = 11 : i64} {
  func.func @input_proj_kernel(%arg0: i32, %arg1: memref<64x16xbf16, #tpu.memory_space<vmem>>, %arg2: memref<16x384xbf16, #tpu.memory_space<vmem>>, %arg3: memref<1x384xf32, #tpu.memory_space<vmem>>, %arg4: memref<64x384xf32, #tpu.memory_space<vmem>>) attributes {dimension_semantics = [#tpu.dimension_semantics<parallel>], iteration_bounds = array<i64: 1>, scalar_prefetch = 0 : i64, scratch_operands = 0 : i64, tpu.core_type = #tpu.core_type<tc>, window_params = [{transform_indices = @transform_0, window_bounds = array<i64: 64, 16>}, {pipeline_mode = #tpu.pipeline_mode<synchronous>, transform_indices = @transform_1, window_bounds = array<i64: 16, 384>}, {pipeline_mode = #tpu.pipeline_mode<synchronous>, transform_indices = @transform_2, window_bounds = array<i64: 1, 384>}, {transform_indices = @transform_3, window_bounds = array<i64: 64, 384>}]} {
    %c0 = arith.constant 0 : index
    %c0_0 = arith.constant 0 : index
    %0 = vector.load %arg1[%c0, %c0_0] : memref<64x16xbf16, #tpu.memory_space<vmem>>, vector<64x16xbf16>
    %c0_1 = arith.constant 0 : index
    %c0_2 = arith.constant 0 : index
    %1 = vector.load %arg2[%c0_1, %c0_2] : memref<16x384xbf16, #tpu.memory_space<vmem>>, vector<16x384xbf16>
    %cst = arith.constant dense<0.000000e+00> : vector<64x384xf32>
    %2 = tpu.matmul %0, %1, %cst {dimension_numbers = #tpu.dot_dimension_numbers<[1], [0], [0], [1], [0, 0, 1, 1], [], []>} : vector<64x16xbf16>, vector<16x384xbf16>, vector<64x384xf32> -> vector<64x384xf32>
    %c0_3 = arith.constant 0 : index
    %c0_4 = arith.constant 0 : index
    %3 = vector.load %arg3[%c0_3, %c0_4] : memref<1x384xf32, #tpu.memory_space<vmem>>, vector<1x384xf32>
    %4 = vector.broadcast %3 : vector<1x384xf32> to vector<64x384xf32>
    %5 = arith.addf %2, %4 : vector<64x384xf32>
    %c0_5 = arith.constant 0 : index
    %c0_6 = arith.constant 0 : index
    %6 = vector.load %arg4[%c0_5, %c0_6] : memref<64x384xf32, #tpu.memory_space<vmem>>, vector<64x384xf32>
    tpu.vector_store %arg4[%c0_5, %c0_6], %5 {strides = array<i32>} : memref<64x384xf32, #tpu.memory_space<vmem>>, vector<64x384xf32>,
    return
  }
  func.func @transform_0(%arg0: i32) -> (i32, i32) {
    %c0_i32 = arith.constant 0 : i32
    %c0_i32_0 = arith.constant 0 : i32
    return %arg0, %c0_i32 : i32, i32
  }
  func.func @transform_1(%arg0: i32) -> (i32, i32) {
    %c0_i32 = arith.constant 0 : i32
    %c0_i32_0 = arith.constant 0 : i32
    %c0_i32_1 = arith.constant 0 : i32
    return %c0_i32, %c0_i32_0 : i32, i32
  }
  func.func @transform_2(%arg0: i32) -> (i32, i32) {
    %c0_i32 = arith.constant 0 : i32
    %c0_i32_0 = arith.constant 0 : i32
    %c0_i32_1 = arith.constant 0 : i32
    return %c0_i32, %c0_i32_0 : i32, i32
  }
  func.func @transform_3(%arg0: i32) -> (i32, i32) {
    %c0_i32 = arith.constant 0 : i32
    %c0_i32_0 = arith.constant 0 : i32
    return %arg0, %c0_i32 : i32, i32
  }
}

module attributes {stable_mosaic.version = 11 : i64} {
  func.func @gru_recurrence_kernel(%arg0: i32, %arg1: memref<8x8x384xf32, #tpu.memory_space<vmem>>, %arg2: memref<128x384xbf16, #tpu.memory_space<vmem>>, %arg3: memref<1x128xf32, #tpu.memory_space<vmem>>, %arg4: memref<8x128xf32, #tpu.memory_space<vmem>>, %arg5: memref<8x8x128xbf16, #tpu.memory_space<vmem>>, %arg6: memref<8x128xf32, #tpu.memory_space<vmem>>) attributes {dimension_semantics = [#tpu.dimension_semantics<arbitrary>], iteration_bounds = array<i64: 1>, scalar_prefetch = 0 : i64, scratch_operands = 0 : i64, tpu.core_type = #tpu.core_type<tc>, window_params = [{transform_indices = @transform_0, window_bounds = array<i64: 8, 8, 384>}, {pipeline_mode = #tpu.pipeline_mode<synchronous>, transform_indices = @transform_1, window_bounds = array<i64: 128, 384>}, {pipeline_mode = #tpu.pipeline_mode<synchronous>, transform_indices = @transform_2, window_bounds = array<i64: 1, 128>}, {pipeline_mode = #tpu.pipeline_mode<synchronous>, transform_indices = @transform_3, window_bounds = array<i64: 8, 128>}, {transform_indices = @transform_4, window_bounds = array<i64: 8, 8, 128>}, {pipeline_mode = #tpu.pipeline_mode<synchronous>, transform_indices = @transform_5, window_bounds = array<i64: 8, 128>}]} {
    %c0_i32 = arith.constant 0 : i32
    %0 = arith.cmpi eq, %arg0, %c0_i32 : i32
    %1 = arith.extui %0 : i1 to i32
    %c0_i32_0 = arith.constant 0 : i32
    %2 = arith.cmpi ne, %1, %c0_i32_0 : i32
    scf.if %2 {
      %c0_72 = arith.constant 0 : index
      %c0_73 = arith.constant 0 : index
      %311 = vector.load %arg4[%c0_72, %c0_73] : memref<8x128xf32, #tpu.memory_space<vmem>>, vector<8x128xf32>
      %c0_74 = arith.constant 0 : index
      %c0_75 = arith.constant 0 : index
      %312 = vector.load %arg6[%c0_74, %c0_75] : memref<8x128xf32, #tpu.memory_space<vmem>>, vector<8x128xf32>
      tpu.vector_store %arg6[%c0_74, %c0_75], %311 {strides = array<i32>} : memref<8x128xf32, #tpu.memory_space<vmem>>, vector<8x128xf32>,
    } else {
    }
    %c0 = arith.constant 0 : index
    %c0_1 = arith.constant 0 : index
    %3 = vector.load %arg2[%c0, %c0_1] : memref<128x384xbf16, #tpu.memory_space<vmem>>, vector<128x384xbf16>
    %c0_2 = arith.constant 0 : index
    %c0_3 = arith.constant 0 : index
    %4 = vector.load %arg3[%c0_2, %c0_3] : memref<1x128xf32, #tpu.memory_space<vmem>>, vector<1x128xf32>
    %c0_4 = arith.constant 0 : index
    %c0_5 = arith.constant 0 : index
    %5 = vector.load %arg6[%c0_4, %c0_5] : memref<8x128xf32, #tpu.memory_space<vmem>>, vector<8x128xf32>
    %c0_i32_6 = arith.constant 0 : i32
    %6 = arith.index_cast %c0_i32_6 : i32 to index
    %c0_7 = arith.constant 0 : index
    %c0_8 = arith.constant 0 : index
    %7 = vector.load %arg1[%6, %c0_7, %c0_8] : memref<8x8x384xf32, #tpu.memory_space<vmem>>, vector<1x8x384xf32>
    %8 = vector.shape_cast %7 : vector<1x8x384xf32> to vector<8x384xf32>
    %9 = arith.truncf %5 : vector<8x128xf32> to vector<8x128xbf16>
    %cst = arith.constant dense<0.000000e+00> : vector<8x384xf32>
    %10 = tpu.matmul %9, %3, %cst {dimension_numbers = #tpu.dot_dimension_numbers<[1], [0], [0], [1], [0, 0, 1, 1], [], []>} : vector<8x128xbf16>, vector<128x384xbf16>, vector<8x384xf32> -> vector<8x384xf32>
    %11 = vector.extract_strided_slice %8 {offsets = [0, 0], sizes = [8, 128], strides = [1, 1]} : vector<8x384xf32> to vector<8x128xf32>
    %12 = vector.extract_strided_slice %10 {offsets = [0, 0], sizes = [8, 128], strides = [1, 1]} : vector<8x384xf32> to vector<8x128xf32>
    %13 = arith.addf %11, %12 : vector<8x128xf32>
    %14 = arith.negf %13 : vector<8x128xf32>
    %15 = math.exp %14 : vector<8x128xf32>
    %cst_9 = arith.constant 1.000000e+00 : f32
    %16 = vector.broadcast %cst_9 : f32 to vector<8x128xf32>
    %17 = arith.addf %16, %15 : vector<8x128xf32>
    %18 = arith.divf %16, %17 : vector<8x128xf32>
    %19 = vector.extract_strided_slice %8 {offsets = [0, 128], sizes = [8, 128], strides = [1, 1]} : vector<8x384xf32> to vector<8x128xf32>
    %20 = vector.extract_strided_slice %10 {offsets = [0, 128], sizes = [8, 128], strides = [1, 1]} : vector<8x384xf32> to vector<8x128xf32>
    %21 = arith.addf %19, %20 : vector<8x128xf32>
    %22 = arith.negf %21 : vector<8x128xf32>
    %23 = math.exp %22 : vector<8x128xf32>
    %cst_10 = arith.constant 1.000000e+00 : f32
    %24 = vector.broadcast %cst_10 : f32 to vector<8x128xf32>
    %25 = arith.addf %24, %23 : vector<8x128xf32>
    %26 = arith.divf %24, %25 : vector<8x128xf32>
    %27 = vector.extract_strided_slice %8 {offsets = [0, 256], sizes = [8, 128], strides = [1, 1]} : vector<8x384xf32> to vector<8x128xf32>
    %28 = vector.extract_strided_slice %10 {offsets = [0, 256], sizes = [8, 128], strides = [1, 1]} : vector<8x384xf32> to vector<8x128xf32>
    %29 = vector.broadcast %4 : vector<1x128xf32> to vector<8x128xf32>
    %30 = arith.addf %28, %29 : vector<8x128xf32>
    %31 = arith.mulf %18, %30 : vector<8x128xf32>
    %32 = arith.addf %27, %31 : vector<8x128xf32>
    %33 = math.tanh %32 : vector<8x128xf32>
    %cst_11 = arith.constant 1.000000e+00 : f32
    %34 = vector.broadcast %cst_11 : f32 to vector<8x128xf32>
    %35 = arith.subf %34, %26 : vector<8x128xf32>
    %36 = arith.mulf %35, %33 : vector<8x128xf32>
    %37 = arith.mulf %26, %5 : vector<8x128xf32>
    %38 = arith.addf %36, %37 : vector<8x128xf32>
    %39 = arith.truncf %38 : vector<8x128xf32> to vector<8x128xbf16>
    %40 = arith.index_cast %c0_i32_6 : i32 to index
    %c0_12 = arith.constant 0 : index
    %c0_13 = arith.constant 0 : index
    %41 = vector.load %arg5[%40, %c0_12, %c0_13] : memref<8x8x128xbf16, #tpu.memory_space<vmem>>, vector<1x8x128xbf16>
    %42 = vector.shape_cast %41 : vector<1x8x128xbf16> to vector<8x128xbf16>
    %43 = vector.shape_cast %39 : vector<8x128xbf16> to vector<1x8x128xbf16>
    tpu.vector_store %arg5[%40, %c0_12, %c0_13], %43 {strides = array<i32>} : memref<8x8x128xbf16, #tpu.memory_space<vmem>>, vector<1x8x128xbf16>,
    %c1_i32 = arith.constant 1 : i32
    %44 = arith.index_cast %c1_i32 : i32 to index
    %c0_14 = arith.constant 0 : index
    %c0_15 = arith.constant 0 : index
    %45 = vector.load %arg1[%44, %c0_14, %c0_15] : memref<8x8x384xf32, #tpu.memory_space<vmem>>, vector<1x8x384xf32>
    %46 = vector.shape_cast %45 : vector<1x8x384xf32> to vector<8x384xf32>
    %47 = arith.truncf %38 : vector<8x128xf32> to vector<8x128xbf16>
    %cst_16 = arith.constant dense<0.000000e+00> : vector<8x384xf32>
    %48 = tpu.matmul %47, %3, %cst_16 {dimension_numbers = #tpu.dot_dimension_numbers<[1], [0], [0], [1], [0, 0, 1, 1], [], []>} : vector<8x128xbf16>, vector<128x384xbf16>, vector<8x384xf32> -> vector<8x384xf32>
    %49 = vector.extract_strided_slice %46 {offsets = [0, 0], sizes = [8, 128], strides = [1, 1]} : vector<8x384xf32> to vector<8x128xf32>
    %50 = vector.extract_strided_slice %48 {offsets = [0, 0], sizes = [8, 128], strides = [1, 1]} : vector<8x384xf32> to vector<8x128xf32>
    %51 = arith.addf %49, %50 : vector<8x128xf32>
    %52 = arith.negf %51 : vector<8x128xf32>
    %53 = math.exp %52 : vector<8x128xf32>
    %cst_17 = arith.constant 1.000000e+00 : f32
    %54 = vector.broadcast %cst_17 : f32 to vector<8x128xf32>
    %55 = arith.addf %54, %53 : vector<8x128xf32>
    %56 = arith.divf %54, %55 : vector<8x128xf32>
    %57 = vector.extract_strided_slice %46 {offsets = [0, 128], sizes = [8, 128], strides = [1, 1]} : vector<8x384xf32> to vector<8x128xf32>
    %58 = vector.extract_strided_slice %48 {offsets = [0, 128], sizes = [8, 128], strides = [1, 1]} : vector<8x384xf32> to vector<8x128xf32>
    %59 = arith.addf %57, %58 : vector<8x128xf32>
    %60 = arith.negf %59 : vector<8x128xf32>
    %61 = math.exp %60 : vector<8x128xf32>
    %cst_18 = arith.constant 1.000000e+00 : f32
    %62 = vector.broadcast %cst_18 : f32 to vector<8x128xf32>
    %63 = arith.addf %62, %61 : vector<8x128xf32>
    %64 = arith.divf %62, %63 : vector<8x128xf32>
    %65 = vector.extract_strided_slice %46 {offsets = [0, 256], sizes = [8, 128], strides = [1, 1]} : vector<8x384xf32> to vector<8x128xf32>
    %66 = vector.extract_strided_slice %48 {offsets = [0, 256], sizes = [8, 128], strides = [1, 1]} : vector<8x384xf32> to vector<8x128xf32>
    %67 = vector.broadcast %4 : vector<1x128xf32> to vector<8x128xf32>
    %68 = arith.addf %66, %67 : vector<8x128xf32>
    %69 = arith.mulf %56, %68 : vector<8x128xf32>
    %70 = arith.addf %65, %69 : vector<8x128xf32>
    %71 = math.tanh %70 : vector<8x128xf32>
    %cst_19 = arith.constant 1.000000e+00 : f32
    %72 = vector.broadcast %cst_19 : f32 to vector<8x128xf32>
    %73 = arith.subf %72, %64 : vector<8x128xf32>
    %74 = arith.mulf %73, %71 : vector<8x128xf32>
    %75 = arith.mulf %64, %38 : vector<8x128xf32>
    %76 = arith.addf %74, %75 : vector<8x128xf32>
    %77 = arith.truncf %76 : vector<8x128xf32> to vector<8x128xbf16>
    %78 = arith.index_cast %c1_i32 : i32 to index
    %c0_20 = arith.constant 0 : index
    %c0_21 = arith.constant 0 : index
    %79 = vector.load %arg5[%78, %c0_20, %c0_21] : memref<8x8x128xbf16, #tpu.memory_space<vmem>>, vector<1x8x128xbf16>
    %80 = vector.shape_cast %79 : vector<1x8x128xbf16> to vector<8x128xbf16>
    %81 = vector.shape_cast %77 : vector<8x128xbf16> to vector<1x8x128xbf16>
    tpu.vector_store %arg5[%78, %c0_20, %c0_21], %81 {strides = array<i32>} : memref<8x8x128xbf16, #tpu.memory_space<vmem>>, vector<1x8x128xbf16>,
    %c2_i32 = arith.constant 2 : i32
    %82 = arith.index_cast %c2_i32 : i32 to index
    %c0_22 = arith.constant 0 : index
    %c0_23 = arith.constant 0 : index
    %83 = vector.load %arg1[%82, %c0_22, %c0_23] : memref<8x8x384xf32, #tpu.memory_space<vmem>>, vector<1x8x384xf32>
    %84 = vector.shape_cast %83 : vector<1x8x384xf32> to vector<8x384xf32>
    %85 = arith.truncf %76 : vector<8x128xf32> to vector<8x128xbf16>
    %cst_24 = arith.constant dense<0.000000e+00> : vector<8x384xf32>
    %86 = tpu.matmul %85, %3, %cst_24 {dimension_numbers = #tpu.dot_dimension_numbers<[1], [0], [0], [1], [0, 0, 1, 1], [], []>} : vector<8x128xbf16>, vector<128x384xbf16>, vector<8x384xf32> -> vector<8x384xf32>
    %87 = vector.extract_strided_slice %84 {offsets = [0, 0], sizes = [8, 128], strides = [1, 1]} : vector<8x384xf32> to vector<8x128xf32>
    %88 = vector.extract_strided_slice %86 {offsets = [0, 0], sizes = [8, 128], strides = [1, 1]} : vector<8x384xf32> to vector<8x128xf32>
    %89 = arith.addf %87, %88 : vector<8x128xf32>
    %90 = arith.negf %89 : vector<8x128xf32>
    %91 = math.exp %90 : vector<8x128xf32>
    %cst_25 = arith.constant 1.000000e+00 : f32
    %92 = vector.broadcast %cst_25 : f32 to vector<8x128xf32>
    %93 = arith.addf %92, %91 : vector<8x128xf32>
    %94 = arith.divf %92, %93 : vector<8x128xf32>
    %95 = vector.extract_strided_slice %84 {offsets = [0, 128], sizes = [8, 128], strides = [1, 1]} : vector<8x384xf32> to vector<8x128xf32>
    %96 = vector.extract_strided_slice %86 {offsets = [0, 128], sizes = [8, 128], strides = [1, 1]} : vector<8x384xf32> to vector<8x128xf32>
    %97 = arith.addf %95, %96 : vector<8x128xf32>
    %98 = arith.negf %97 : vector<8x128xf32>
    %99 = math.exp %98 : vector<8x128xf32>
    %cst_26 = arith.constant 1.000000e+00 : f32
    %100 = vector.broadcast %cst_26 : f32 to vector<8x128xf32>
    %101 = arith.addf %100, %99 : vector<8x128xf32>
    %102 = arith.divf %100, %101 : vector<8x128xf32>
    %103 = vector.extract_strided_slice %84 {offsets = [0, 256], sizes = [8, 128], strides = [1, 1]} : vector<8x384xf32> to vector<8x128xf32>
    %104 = vector.extract_strided_slice %86 {offsets = [0, 256], sizes = [8, 128], strides = [1, 1]} : vector<8x384xf32> to vector<8x128xf32>
    %105 = vector.broadcast %4 : vector<1x128xf32> to vector<8x128xf32>
    %106 = arith.addf %104, %105 : vector<8x128xf32>
    %107 = arith.mulf %94, %106 : vector<8x128xf32>
    %108 = arith.addf %103, %107 : vector<8x128xf32>
    %109 = math.tanh %108 : vector<8x128xf32>
    %cst_27 = arith.constant 1.000000e+00 : f32
    %110 = vector.broadcast %cst_27 : f32 to vector<8x128xf32>
    %111 = arith.subf %110, %102 : vector<8x128xf32>
    %112 = arith.mulf %111, %109 : vector<8x128xf32>
    %113 = arith.mulf %102, %76 : vector<8x128xf32>
    %114 = arith.addf %112, %113 : vector<8x128xf32>
    %115 = arith.truncf %114 : vector<8x128xf32> to vector<8x128xbf16>
    %116 = arith.index_cast %c2_i32 : i32 to index
    %c0_28 = arith.constant 0 : index
    %c0_29 = arith.constant 0 : index
    %117 = vector.load %arg5[%116, %c0_28, %c0_29] : memref<8x8x128xbf16, #tpu.memory_space<vmem>>, vector<1x8x128xbf16>
    %118 = vector.shape_cast %117 : vector<1x8x128xbf16> to vector<8x128xbf16>
    %119 = vector.shape_cast %115 : vector<8x128xbf16> to vector<1x8x128xbf16>
    tpu.vector_store %arg5[%116, %c0_28, %c0_29], %119 {strides = array<i32>} : memref<8x8x128xbf16, #tpu.memory_space<vmem>>, vector<1x8x128xbf16>,
    %c3_i32 = arith.constant 3 : i32
    %120 = arith.index_cast %c3_i32 : i32 to index
    %c0_30 = arith.constant 0 : index
    %c0_31 = arith.constant 0 : index
    %121 = vector.load %arg1[%120, %c0_30, %c0_31] : memref<8x8x384xf32, #tpu.memory_space<vmem>>, vector<1x8x384xf32>
    %122 = vector.shape_cast %121 : vector<1x8x384xf32> to vector<8x384xf32>
    %123 = arith.truncf %114 : vector<8x128xf32> to vector<8x128xbf16>
    %cst_32 = arith.constant dense<0.000000e+00> : vector<8x384xf32>
    %124 = tpu.matmul %123, %3, %cst_32 {dimension_numbers = #tpu.dot_dimension_numbers<[1], [0], [0], [1], [0, 0, 1, 1], [], []>} : vector<8x128xbf16>, vector<128x384xbf16>, vector<8x384xf32> -> vector<8x384xf32>
    %125 = vector.extract_strided_slice %122 {offsets = [0, 0], sizes = [8, 128], strides = [1, 1]} : vector<8x384xf32> to vector<8x128xf32>
    %126 = vector.extract_strided_slice %124 {offsets = [0, 0], sizes = [8, 128], strides = [1, 1]} : vector<8x384xf32> to vector<8x128xf32>
    %127 = arith.addf %125, %126 : vector<8x128xf32>
    %128 = arith.negf %127 : vector<8x128xf32>
    %129 = math.exp %128 : vector<8x128xf32>
    %cst_33 = arith.constant 1.000000e+00 : f32
    %130 = vector.broadcast %cst_33 : f32 to vector<8x128xf32>
    %131 = arith.addf %130, %129 : vector<8x128xf32>
    %132 = arith.divf %130, %131 : vector<8x128xf32>
    %133 = vector.extract_strided_slice %122 {offsets = [0, 128], sizes = [8, 128], strides = [1, 1]} : vector<8x384xf32> to vector<8x128xf32>
    %134 = vector.extract_strided_slice %124 {offsets = [0, 128], sizes = [8, 128], strides = [1, 1]} : vector<8x384xf32> to vector<8x128xf32>
    %135 = arith.addf %133, %134 : vector<8x128xf32>
    %136 = arith.negf %135 : vector<8x128xf32>
    %137 = math.exp %136 : vector<8x128xf32>
    %cst_34 = arith.constant 1.000000e+00 : f32
    %138 = vector.broadcast %cst_34 : f32 to vector<8x128xf32>
    %139 = arith.addf %138, %137 : vector<8x128xf32>
    %140 = arith.divf %138, %139 : vector<8x128xf32>
    %141 = vector.extract_strided_slice %122 {offsets = [0, 256], sizes = [8, 128], strides = [1, 1]} : vector<8x384xf32> to vector<8x128xf32>
    %142 = vector.extract_strided_slice %124 {offsets = [0, 256], sizes = [8, 128], strides = [1, 1]} : vector<8x384xf32> to vector<8x128xf32>
    %143 = vector.broadcast %4 : vector<1x128xf32> to vector<8x128xf32>
    %144 = arith.addf %142, %143 : vector<8x128xf32>
    %145 = arith.mulf %132, %144 : vector<8x128xf32>
    %146 = arith.addf %141, %145 : vector<8x128xf32>
    %147 = math.tanh %146 : vector<8x128xf32>
    %cst_35 = arith.constant 1.000000e+00 : f32
    %148 = vector.broadcast %cst_35 : f32 to vector<8x128xf32>
    %149 = arith.subf %148, %140 : vector<8x128xf32>
    %150 = arith.mulf %149, %147 : vector<8x128xf32>
    %151 = arith.mulf %140, %114 : vector<8x128xf32>
    %152 = arith.addf %150, %151 : vector<8x128xf32>
    %153 = arith.truncf %152 : vector<8x128xf32> to vector<8x128xbf16>
    %154 = arith.index_cast %c3_i32 : i32 to index
    %c0_36 = arith.constant 0 : index
    %c0_37 = arith.constant 0 : index
    %155 = vector.load %arg5[%154, %c0_36, %c0_37] : memref<8x8x128xbf16, #tpu.memory_space<vmem>>, vector<1x8x128xbf16>
    %156 = vector.shape_cast %155 : vector<1x8x128xbf16> to vector<8x128xbf16>
    %157 = vector.shape_cast %153 : vector<8x128xbf16> to vector<1x8x128xbf16>
    tpu.vector_store %arg5[%154, %c0_36, %c0_37], %157 {strides = array<i32>} : memref<8x8x128xbf16, #tpu.memory_space<vmem>>, vector<1x8x128xbf16>,
    %c4_i32 = arith.constant 4 : i32
    %158 = arith.index_cast %c4_i32 : i32 to index
    %c0_38 = arith.constant 0 : index
    %c0_39 = arith.constant 0 : index
    %159 = vector.load %arg1[%158, %c0_38, %c0_39] : memref<8x8x384xf32, #tpu.memory_space<vmem>>, vector<1x8x384xf32>
    %160 = vector.shape_cast %159 : vector<1x8x384xf32> to vector<8x384xf32>
    %161 = arith.truncf %152 : vector<8x128xf32> to vector<8x128xbf16>
    %cst_40 = arith.constant dense<0.000000e+00> : vector<8x384xf32>
    %162 = tpu.matmul %161, %3, %cst_40 {dimension_numbers = #tpu.dot_dimension_numbers<[1], [0], [0], [1], [0, 0, 1, 1], [], []>} : vector<8x128xbf16>, vector<128x384xbf16>, vector<8x384xf32> -> vector<8x384xf32>
    %163 = vector.extract_strided_slice %160 {offsets = [0, 0], sizes = [8, 128], strides = [1, 1]} : vector<8x384xf32> to vector<8x128xf32>
    %164 = vector.extract_strided_slice %162 {offsets = [0, 0], sizes = [8, 128], strides = [1, 1]} : vector<8x384xf32> to vector<8x128xf32>
    %165 = arith.addf %163, %164 : vector<8x128xf32>
    %166 = arith.negf %165 : vector<8x128xf32>
    %167 = math.exp %166 : vector<8x128xf32>
    %cst_41 = arith.constant 1.000000e+00 : f32
    %168 = vector.broadcast %cst_41 : f32 to vector<8x128xf32>
    %169 = arith.addf %168, %167 : vector<8x128xf32>
    %170 = arith.divf %168, %169 : vector<8x128xf32>
    %171 = vector.extract_strided_slice %160 {offsets = [0, 128], sizes = [8, 128], strides = [1, 1]} : vector<8x384xf32> to vector<8x128xf32>
    %172 = vector.extract_strided_slice %162 {offsets = [0, 128], sizes = [8, 128], strides = [1, 1]} : vector<8x384xf32> to vector<8x128xf32>
    %173 = arith.addf %171, %172 : vector<8x128xf32>
    %174 = arith.negf %173 : vector<8x128xf32>
    %175 = math.exp %174 : vector<8x128xf32>
    %cst_42 = arith.constant 1.000000e+00 : f32
    %176 = vector.broadcast %cst_42 : f32 to vector<8x128xf32>
    %177 = arith.addf %176, %175 : vector<8x128xf32>
    %178 = arith.divf %176, %177 : vector<8x128xf32>
    %179 = vector.extract_strided_slice %160 {offsets = [0, 256], sizes = [8, 128], strides = [1, 1]} : vector<8x384xf32> to vector<8x128xf32>
    %180 = vector.extract_strided_slice %162 {offsets = [0, 256], sizes = [8, 128], strides = [1, 1]} : vector<8x384xf32> to vector<8x128xf32>
    %181 = vector.broadcast %4 : vector<1x128xf32> to vector<8x128xf32>
    %182 = arith.addf %180, %181 : vector<8x128xf32>
    %183 = arith.mulf %170, %182 : vector<8x128xf32>
    %184 = arith.addf %179, %183 : vector<8x128xf32>
    %185 = math.tanh %184 : vector<8x128xf32>
    %cst_43 = arith.constant 1.000000e+00 : f32
    %186 = vector.broadcast %cst_43 : f32 to vector<8x128xf32>
    %187 = arith.subf %186, %178 : vector<8x128xf32>
    %188 = arith.mulf %187, %185 : vector<8x128xf32>
    %189 = arith.mulf %178, %152 : vector<8x128xf32>
    %190 = arith.addf %188, %189 : vector<8x128xf32>
    %191 = arith.truncf %190 : vector<8x128xf32> to vector<8x128xbf16>
    %192 = arith.index_cast %c4_i32 : i32 to index
    %c0_44 = arith.constant 0 : index
    %c0_45 = arith.constant 0 : index
    %193 = vector.load %arg5[%192, %c0_44, %c0_45] : memref<8x8x128xbf16, #tpu.memory_space<vmem>>, vector<1x8x128xbf16>
    %194 = vector.shape_cast %193 : vector<1x8x128xbf16> to vector<8x128xbf16>
    %195 = vector.shape_cast %191 : vector<8x128xbf16> to vector<1x8x128xbf16>
    tpu.vector_store %arg5[%192, %c0_44, %c0_45], %195 {strides = array<i32>} : memref<8x8x128xbf16, #tpu.memory_space<vmem>>, vector<1x8x128xbf16>,
    %c5_i32 = arith.constant 5 : i32
    %196 = arith.index_cast %c5_i32 : i32 to index
    %c0_46 = arith.constant 0 : index
    %c0_47 = arith.constant 0 : index
    %197 = vector.load %arg1[%196, %c0_46, %c0_47] : memref<8x8x384xf32, #tpu.memory_space<vmem>>, vector<1x8x384xf32>
    %198 = vector.shape_cast %197 : vector<1x8x384xf32> to vector<8x384xf32>
    %199 = arith.truncf %190 : vector<8x128xf32> to vector<8x128xbf16>
    %cst_48 = arith.constant dense<0.000000e+00> : vector<8x384xf32>
    %200 = tpu.matmul %199, %3, %cst_48 {dimension_numbers = #tpu.dot_dimension_numbers<[1], [0], [0], [1], [0, 0, 1, 1], [], []>} : vector<8x128xbf16>, vector<128x384xbf16>, vector<8x384xf32> -> vector<8x384xf32>
    %201 = vector.extract_strided_slice %198 {offsets = [0, 0], sizes = [8, 128], strides = [1, 1]} : vector<8x384xf32> to vector<8x128xf32>
    %202 = vector.extract_strided_slice %200 {offsets = [0, 0], sizes = [8, 128], strides = [1, 1]} : vector<8x384xf32> to vector<8x128xf32>
    %203 = arith.addf %201, %202 : vector<8x128xf32>
    %204 = arith.negf %203 : vector<8x128xf32>
    %205 = math.exp %204 : vector<8x128xf32>
    %cst_49 = arith.constant 1.000000e+00 : f32
    %206 = vector.broadcast %cst_49 : f32 to vector<8x128xf32>
    %207 = arith.addf %206, %205 : vector<8x128xf32>
    %208 = arith.divf %206, %207 : vector<8x128xf32>
    %209 = vector.extract_strided_slice %198 {offsets = [0, 128], sizes = [8, 128], strides = [1, 1]} : vector<8x384xf32> to vector<8x128xf32>
    %210 = vector.extract_strided_slice %200 {offsets = [0, 128], sizes = [8, 128], strides = [1, 1]} : vector<8x384xf32> to vector<8x128xf32>
    %211 = arith.addf %209, %210 : vector<8x128xf32>
    %212 = arith.negf %211 : vector<8x128xf32>
    %213 = math.exp %212 : vector<8x128xf32>
    %cst_50 = arith.constant 1.000000e+00 : f32
    %214 = vector.broadcast %cst_50 : f32 to vector<8x128xf32>
    %215 = arith.addf %214, %213 : vector<8x128xf32>
    %216 = arith.divf %214, %215 : vector<8x128xf32>
    %217 = vector.extract_strided_slice %198 {offsets = [0, 256], sizes = [8, 128], strides = [1, 1]} : vector<8x384xf32> to vector<8x128xf32>
    %218 = vector.extract_strided_slice %200 {offsets = [0, 256], sizes = [8, 128], strides = [1, 1]} : vector<8x384xf32> to vector<8x128xf32>
    %219 = vector.broadcast %4 : vector<1x128xf32> to vector<8x128xf32>
    %220 = arith.addf %218, %219 : vector<8x128xf32>
    %221 = arith.mulf %208, %220 : vector<8x128xf32>
    %222 = arith.addf %217, %221 : vector<8x128xf32>
    %223 = math.tanh %222 : vector<8x128xf32>
    %cst_51 = arith.constant 1.000000e+00 : f32
    %224 = vector.broadcast %cst_51 : f32 to vector<8x128xf32>
    %225 = arith.subf %224, %216 : vector<8x128xf32>
    %226 = arith.mulf %225, %223 : vector<8x128xf32>
    %227 = arith.mulf %216, %190 : vector<8x128xf32>
    %228 = arith.addf %226, %227 : vector<8x128xf32>
    %229 = arith.truncf %228 : vector<8x128xf32> to vector<8x128xbf16>
    %230 = arith.index_cast %c5_i32 : i32 to index
    %c0_52 = arith.constant 0 : index
    %c0_53 = arith.constant 0 : index
    %231 = vector.load %arg5[%230, %c0_52, %c0_53] : memref<8x8x128xbf16, #tpu.memory_space<vmem>>, vector<1x8x128xbf16>
    %232 = vector.shape_cast %231 : vector<1x8x128xbf16> to vector<8x128xbf16>
    %233 = vector.shape_cast %229 : vector<8x128xbf16> to vector<1x8x128xbf16>
    tpu.vector_store %arg5[%230, %c0_52, %c0_53], %233 {strides = array<i32>} : memref<8x8x128xbf16, #tpu.memory_space<vmem>>, vector<1x8x128xbf16>,
    %c6_i32 = arith.constant 6 : i32
    %234 = arith.index_cast %c6_i32 : i32 to index
    %c0_54 = arith.constant 0 : index
    %c0_55 = arith.constant 0 : index
    %235 = vector.load %arg1[%234, %c0_54, %c0_55] : memref<8x8x384xf32, #tpu.memory_space<vmem>>, vector<1x8x384xf32>
    %236 = vector.shape_cast %235 : vector<1x8x384xf32> to vector<8x384xf32>
    %237 = arith.truncf %228 : vector<8x128xf32> to vector<8x128xbf16>
    %cst_56 = arith.constant dense<0.000000e+00> : vector<8x384xf32>
    %238 = tpu.matmul %237, %3, %cst_56 {dimension_numbers = #tpu.dot_dimension_numbers<[1], [0], [0], [1], [0, 0, 1, 1], [], []>} : vector<8x128xbf16>, vector<128x384xbf16>, vector<8x384xf32> -> vector<8x384xf32>
    %239 = vector.extract_strided_slice %236 {offsets = [0, 0], sizes = [8, 128], strides = [1, 1]} : vector<8x384xf32> to vector<8x128xf32>
    %240 = vector.extract_strided_slice %238 {offsets = [0, 0], sizes = [8, 128], strides = [1, 1]} : vector<8x384xf32> to vector<8x128xf32>
    %241 = arith.addf %239, %240 : vector<8x128xf32>
    %242 = arith.negf %241 : vector<8x128xf32>
    %243 = math.exp %242 : vector<8x128xf32>
    %cst_57 = arith.constant 1.000000e+00 : f32
    %244 = vector.broadcast %cst_57 : f32 to vector<8x128xf32>
    %245 = arith.addf %244, %243 : vector<8x128xf32>
    %246 = arith.divf %244, %245 : vector<8x128xf32>
    %247 = vector.extract_strided_slice %236 {offsets = [0, 128], sizes = [8, 128], strides = [1, 1]} : vector<8x384xf32> to vector<8x128xf32>
    %248 = vector.extract_strided_slice %238 {offsets = [0, 128], sizes = [8, 128], strides = [1, 1]} : vector<8x384xf32> to vector<8x128xf32>
    %249 = arith.addf %247, %248 : vector<8x128xf32>
    %250 = arith.negf %249 : vector<8x128xf32>
    %251 = math.exp %250 : vector<8x128xf32>
    %cst_58 = arith.constant 1.000000e+00 : f32
    %252 = vector.broadcast %cst_58 : f32 to vector<8x128xf32>
    %253 = arith.addf %252, %251 : vector<8x128xf32>
    %254 = arith.divf %252, %253 : vector<8x128xf32>
    %255 = vector.extract_strided_slice %236 {offsets = [0, 256], sizes = [8, 128], strides = [1, 1]} : vector<8x384xf32> to vector<8x128xf32>
    %256 = vector.extract_strided_slice %238 {offsets = [0, 256], sizes = [8, 128], strides = [1, 1]} : vector<8x384xf32> to vector<8x128xf32>
    %257 = vector.broadcast %4 : vector<1x128xf32> to vector<8x128xf32>
    %258 = arith.addf %256, %257 : vector<8x128xf32>
    %259 = arith.mulf %246, %258 : vector<8x128xf32>
    %260 = arith.addf %255, %259 : vector<8x128xf32>
    %261 = math.tanh %260 : vector<8x128xf32>
    %cst_59 = arith.constant 1.000000e+00 : f32
    %262 = vector.broadcast %cst_59 : f32 to vector<8x128xf32>
    %263 = arith.subf %262, %254 : vector<8x128xf32>
    %264 = arith.mulf %263, %261 : vector<8x128xf32>
    %265 = arith.mulf %254, %228 : vector<8x128xf32>
    %266 = arith.addf %264, %265 : vector<8x128xf32>
    %267 = arith.truncf %266 : vector<8x128xf32> to vector<8x128xbf16>
    %268 = arith.index_cast %c6_i32 : i32 to index
    %c0_60 = arith.constant 0 : index
    %c0_61 = arith.constant 0 : index
    %269 = vector.load %arg5[%268, %c0_60, %c0_61] : memref<8x8x128xbf16, #tpu.memory_space<vmem>>, vector<1x8x128xbf16>
    %270 = vector.shape_cast %269 : vector<1x8x128xbf16> to vector<8x128xbf16>
    %271 = vector.shape_cast %267 : vector<8x128xbf16> to vector<1x8x128xbf16>
    tpu.vector_store %arg5[%268, %c0_60, %c0_61], %271 {strides = array<i32>} : memref<8x8x128xbf16, #tpu.memory_space<vmem>>, vector<1x8x128xbf16>,
    %c7_i32 = arith.constant 7 : i32
    %272 = arith.index_cast %c7_i32 : i32 to index
    %c0_62 = arith.constant 0 : index
    %c0_63 = arith.constant 0 : index
    %273 = vector.load %arg1[%272, %c0_62, %c0_63] : memref<8x8x384xf32, #tpu.memory_space<vmem>>, vector<1x8x384xf32>
    %274 = vector.shape_cast %273 : vector<1x8x384xf32> to vector<8x384xf32>
    %275 = arith.truncf %266 : vector<8x128xf32> to vector<8x128xbf16>
    %cst_64 = arith.constant dense<0.000000e+00> : vector<8x384xf32>
    %276 = tpu.matmul %275, %3, %cst_64 {dimension_numbers = #tpu.dot_dimension_numbers<[1], [0], [0], [1], [0, 0, 1, 1], [], []>} : vector<8x128xbf16>, vector<128x384xbf16>, vector<8x384xf32> -> vector<8x384xf32>
    %277 = vector.extract_strided_slice %274 {offsets = [0, 0], sizes = [8, 128], strides = [1, 1]} : vector<8x384xf32> to vector<8x128xf32>
    %278 = vector.extract_strided_slice %276 {offsets = [0, 0], sizes = [8, 128], strides = [1, 1]} : vector<8x384xf32> to vector<8x128xf32>
    %279 = arith.addf %277, %278 : vector<8x128xf32>
    %280 = arith.negf %279 : vector<8x128xf32>
    %281 = math.exp %280 : vector<8x128xf32>
    %cst_65 = arith.constant 1.000000e+00 : f32
    %282 = vector.broadcast %cst_65 : f32 to vector<8x128xf32>
    %283 = arith.addf %282, %281 : vector<8x128xf32>
    %284 = arith.divf %282, %283 : vector<8x128xf32>
    %285 = vector.extract_strided_slice %274 {offsets = [0, 128], sizes = [8, 128], strides = [1, 1]} : vector<8x384xf32> to vector<8x128xf32>
    %286 = vector.extract_strided_slice %276 {offsets = [0, 128], sizes = [8, 128], strides = [1, 1]} : vector<8x384xf32> to vector<8x128xf32>
    %287 = arith.addf %285, %286 : vector<8x128xf32>
    %288 = arith.negf %287 : vector<8x128xf32>
    %289 = math.exp %288 : vector<8x128xf32>
    %cst_66 = arith.constant 1.000000e+00 : f32
    %290 = vector.broadcast %cst_66 : f32 to vector<8x128xf32>
    %291 = arith.addf %290, %289 : vector<8x128xf32>
    %292 = arith.divf %290, %291 : vector<8x128xf32>
    %293 = vector.extract_strided_slice %274 {offsets = [0, 256], sizes = [8, 128], strides = [1, 1]} : vector<8x384xf32> to vector<8x128xf32>
    %294 = vector.extract_strided_slice %276 {offsets = [0, 256], sizes = [8, 128], strides = [1, 1]} : vector<8x384xf32> to vector<8x128xf32>
    %295 = vector.broadcast %4 : vector<1x128xf32> to vector<8x128xf32>
    %296 = arith.addf %294, %295 : vector<8x128xf32>
    %297 = arith.mulf %284, %296 : vector<8x128xf32>
    %298 = arith.addf %293, %297 : vector<8x128xf32>
    %299 = math.tanh %298 : vector<8x128xf32>
    %cst_67 = arith.constant 1.000000e+00 : f32
    %300 = vector.broadcast %cst_67 : f32 to vector<8x128xf32>
    %301 = arith.subf %300, %292 : vector<8x128xf32>
    %302 = arith.mulf %301, %299 : vector<8x128xf32>
    %303 = arith.mulf %292, %266 : vector<8x128xf32>
    %304 = arith.addf %302, %303 : vector<8x128xf32>
    %305 = arith.truncf %304 : vector<8x128xf32> to vector<8x128xbf16>
    %306 = arith.index_cast %c7_i32 : i32 to index
    %c0_68 = arith.constant 0 : index
    %c0_69 = arith.constant 0 : index
    %307 = vector.load %arg5[%306, %c0_68, %c0_69] : memref<8x8x128xbf16, #tpu.memory_space<vmem>>, vector<1x8x128xbf16>
    %308 = vector.shape_cast %307 : vector<1x8x128xbf16> to vector<8x128xbf16>
    %309 = vector.shape_cast %305 : vector<8x128xbf16> to vector<1x8x128xbf16>
    tpu.vector_store %arg5[%306, %c0_68, %c0_69], %309 {strides = array<i32>} : memref<8x8x128xbf16, #tpu.memory_space<vmem>>, vector<1x8x128xbf16>,
    %c8_i32 = arith.constant 8 : i32
    %c0_70 = arith.constant 0 : index
    %c0_71 = arith.constant 0 : index
    %310 = vector.load %arg6[%c0_70, %c0_71] : memref<8x128xf32, #tpu.memory_space<vmem>>, vector<8x128xf32>
    tpu.vector_store %arg6[%c0_70, %c0_71], %304 {strides = array<i32>} : memref<8x128xf32, #tpu.memory_space<vmem>>, vector<8x128xf32>,
    return
  }
  func.func @transform_0(%arg0: i32) -> (i32, i32, i32) {
    %c0_i32 = arith.constant 0 : i32
    %c0_i32_0 = arith.constant 0 : i32
    %c0_i32_1 = arith.constant 0 : i32
    return %arg0, %c0_i32, %c0_i32_0 : i32, i32, i32
  }
  func.func @transform_1(%arg0: i32) -> (i32, i32) {
    %c0_i32 = arith.constant 0 : i32
    %c0_i32_0 = arith.constant 0 : i32
    %c0_i32_1 = arith.constant 0 : i32
    return %c0_i32, %c0_i32_0 : i32, i32
  }
  func.func @transform_2(%arg0: i32) -> (i32, i32) {
    %c0_i32 = arith.constant 0 : i32
    %c0_i32_0 = arith.constant 0 : i32
    %c0_i32_1 = arith.constant 0 : i32
    return %c0_i32, %c0_i32_0 : i32, i32
  }
  func.func @transform_3(%arg0: i32) -> (i32, i32) {
    %c0_i32 = arith.constant 0 : i32
    %c0_i32_0 = arith.constant 0 : i32
    %c0_i32_1 = arith.constant 0 : i32
    return %c0_i32, %c0_i32_0 : i32, i32
  }
  func.func @transform_4(%arg0: i32) -> (i32, i32, i32) {
    %c0_i32 = arith.constant 0 : i32
    %c0_i32_0 = arith.constant 0 : i32
    %c0_i32_1 = arith.constant 0 : i32
    return %arg0, %c0_i32, %c0_i32_0 : i32, i32, i32
  }
  func.func @transform_5(%arg0: i32) -> (i32, i32) {
    %c0_i32 = arith.constant 0 : i32
    %c0_i32_0 = arith.constant 0 : i32
    %c0_i32_1 = arith.constant 0 : i32
    return %c0_i32, %c0_i32_0 : i32, i32
  }
}

module attributes {stable_mosaic.version = 11 : i64} {
  func.func @out_proj_kernel(%arg0: i32, %arg1: memref<64x128xbf16, #tpu.memory_space<vmem>>, %arg2: memref<128x128xbf16, #tpu.memory_space<vmem>>, %arg3: memref<1x128xf32, #tpu.memory_space<vmem>>, %arg4: memref<64x128xf32, #tpu.memory_space<vmem>>) attributes {dimension_semantics = [#tpu.dimension_semantics<parallel>], iteration_bounds = array<i64: 1>, scalar_prefetch = 0 : i64, scratch_operands = 0 : i64, tpu.core_type = #tpu.core_type<tc>, window_params = [{transform_indices = @transform_0, window_bounds = array<i64: 64, 128>}, {pipeline_mode = #tpu.pipeline_mode<synchronous>, transform_indices = @transform_1, window_bounds = array<i64: 128, 128>}, {pipeline_mode = #tpu.pipeline_mode<synchronous>, transform_indices = @transform_2, window_bounds = array<i64: 1, 128>}, {transform_indices = @transform_3, window_bounds = array<i64: 64, 128>}]} {
    %c0 = arith.constant 0 : index
    %c0_0 = arith.constant 0 : index
    %0 = vector.load %arg1[%c0, %c0_0] : memref<64x128xbf16, #tpu.memory_space<vmem>>, vector<64x128xbf16>
    %c0_1 = arith.constant 0 : index
    %c0_2 = arith.constant 0 : index
    %1 = vector.load %arg2[%c0_1, %c0_2] : memref<128x128xbf16, #tpu.memory_space<vmem>>, vector<128x128xbf16>
    %cst = arith.constant dense<0.000000e+00> : vector<64x128xf32>
    %2 = tpu.matmul %0, %1, %cst {dimension_numbers = #tpu.dot_dimension_numbers<[1], [0], [0], [1], [0, 0, 1, 1], [], []>} : vector<64x128xbf16>, vector<128x128xbf16>, vector<64x128xf32> -> vector<64x128xf32>
    %c0_3 = arith.constant 0 : index
    %c0_4 = arith.constant 0 : index
    %3 = vector.load %arg3[%c0_3, %c0_4] : memref<1x128xf32, #tpu.memory_space<vmem>>, vector<1x128xf32>
    %4 = vector.broadcast %3 : vector<1x128xf32> to vector<64x128xf32>
    %5 = arith.addf %2, %4 : vector<64x128xf32>
    %cst_5 = arith.constant dense<0xFF800000> : vector<64xf32>
    %6 = vector.multi_reduction <maximumf>, %5, %cst_5 [1] : vector<64x128xf32> to vector<64xf32>
    %7 = vector.shape_cast %6 : vector<64xf32> to vector<64x1xf32>
    %8 = vector.broadcast %7 : vector<64x1xf32> to vector<64x128xf32>
    %9 = arith.subf %5, %8 : vector<64x128xf32>
    %10 = math.exp %9 : vector<64x128xf32>
    %cst_6 = arith.constant dense<0.000000e+00> : vector<64xf32>
    %11 = vector.multi_reduction <add>, %10, %cst_6 [1] : vector<64x128xf32> to vector<64xf32>
    %12 = vector.shape_cast %11 : vector<64xf32> to vector<64x1xf32>
    %13 = math.log %12 : vector<64x1xf32>
    %14 = arith.addf %13, %7 : vector<64x1xf32>
    %15 = vector.broadcast %14 : vector<64x1xf32> to vector<64x128xf32>
    %16 = arith.subf %5, %15 : vector<64x128xf32>
    %c0_7 = arith.constant 0 : index
    %c0_8 = arith.constant 0 : index
    %17 = vector.load %arg4[%c0_7, %c0_8] : memref<64x128xf32, #tpu.memory_space<vmem>>, vector<64x128xf32>
    tpu.vector_store %arg4[%c0_7, %c0_8], %16 {strides = array<i32>} : memref<64x128xf32, #tpu.memory_space<vmem>>, vector<64x128xf32>,
    return
  }
  func.func @transform_0(%arg0: i32) -> (i32, i32) {
    %c0_i32 = arith.constant 0 : i32
    %c0_i32_0 = arith.constant 0 : i32
    return %arg0, %c0_i32 : i32, i32
  }
  func.func @transform_1(%arg0: i32) -> (i32, i32) {
    %c0_i32 = arith.constant 0 : i32
    %c0_i32_0 = arith.constant 0 : i32
    %c0_i32_1 = arith.constant 0 : i32
    return %c0_i32, %c0_i32_0 : i32, i32
  }
  func.func @transform_2(%arg0: i32) -> (i32, i32) {
    %c0_i32 = arith.constant 0 : i32
    %c0_i32_0 = arith.constant 0 : i32
    %c0_i32_1 = arith.constant 0 : i32
    return %c0_i32, %c0_i32_0 : i32, i32
  }
  func.func @transform_3(%arg0: i32) -> (i32, i32) {
    %c0_i32 = arith.constant 0 : i32
    %c0_i32_0 = arith.constant 0 : i32
    return %arg0, %c0_i32 : i32, i32
  }
}

</mosaic_0001>

<bundles_post_ra>
// kernel: generator_forward.3
= control target key start
LH: loop header
LB: loop body
LE: loop exit
PB: predicated region body
PF: predicated region fallthrough
CT: control target
= control target key end

     0   :  { %v300_v1 = vmov 0   ;;  %vm80_vm0 = vcmask 130048   ;;  %v29_v8 = vlaneseq  ;;  %s445_s1 = inlined_call_operand.vmem [shape: bf16[16,384], index: 1, kind: input, shape index: {}]   ;;  %s446_s0 = inlined_call_operand.vmem [shape: bf16[64,16], index: 0, kind: input, shape index: {}]   ;;  %s447_s2 = inlined_call_operand.vmem [shape: f32[1,384], index: 2, kind: input, shape index: {}]   ;;  %s448_s3 = inlined_call_operand.vmem [shape: f32[64,384], index: 3, kind: output, shape index: {}]  }
   0x1   :  { %v292_v0 = vld [vmem:[%s445_s1 + $0x4] ss:$12 sps:$4 sm:$0xff]   ;;  %125 = vmatprep.mubr.bf16.mxu0 %v300_v1  ;;  %155 = vmatprep.mubr.bf16.mxu1 %v300_v1  ;;  %v294_v2 = vld [vmem:[%s445_s1] ss:$12 sps:$4 sm:$0xff]   ;;  %v296_v4 = vld [vmem:[%s446_s0 + $0x18] sm:$0xff]  }
   0x2   :  { %107 = vmatprep.subr.bf16.mxu0 %v292_v0  ;;  %289 = vmatprep.subr.bf16.mxu1 %v292_v0  ;;  %v295_v3 = vld [vmem:[%s446_s0] sm:$0xff]   ;;  %v297_v5 = vld [vmem:[%s445_s1 + $0x8] ss:$12 sps:$4 sm:$0xff]   ;;  %v30_v9 = vshrl.u32 %v29_v8, 7 }
   0x3   :  { %108 = vmatpush1.bf16.msra.mxu0 %v294_v2  ;;  %290 = vmatpush1.bf16.msra.mxu1 %v294_v2  ;;  %v298_v6 = vld [vmem:[%s446_s0 + $0x8] sm:$0xff]   ;;  %v299_v7 = vld [vmem:[%s446_s0 + $0x10] sm:$0xff]   ;;  %v27_v11 = vld [vmem:[%s447_s2] sm:$0x7] }
   0x4   :  { %279 = vmatprep.subr.bf16.mxu1 %v297_v5  ;;  %v31_v10 = vsub.s32 0, %v30_v9  ;;  %v35_v12 = vsub.s32 1, %v30_v9  ;;  %v39_v19 = vsub.s32 2, %v30_v9 }
   0x6   :  { %266 = vmatmul.mubr.msk.bf16.vlgmr.msra.gmra.mxu0 %vm80_vm0, %v295_v3  ;;  %269 = vmatmul.mubr.msk.bf16.vlgmr.msra.gmra.mxu1 %vm80_vm0, %v296_v4  ;;  %v353_v13 = vrot.slane %v27_v11, %v31_v10  ;;  %v355_v14 = vrot.slane %v27_v11, %v35_v12  ;;  %v40_v28 = vrot.slane %v27_v11, %v39_v19 }
   0x7   :  { %135 = vmatprep.mubr.bf16.mxu0 %v300_v1  ;;  %280 = vmatpush3.bf16.msra.mxu1 %v297_v5 }
   0x8   :  { %281 = vmatprep.mubr.msk.bf16.mxu1 %vm80_vm0, %v295_v3 }
   0xe   :  { %267 = vmatmul.mubr.msk.bf16.gmra.mxu0 %vm80_vm0, %v298_v6  ;;  %282 = vmatmul.mubr.msk.bf16.vlgmr.msra.gmra.mxu1 %vm80_vm0, %v298_v6 }
   0xf   :  { %145 = vmatprep.mubr.bf16.mxu0 %v300_v1  ;;  %285 = vmatprep.mubr.msk.bf16.mxu1 %vm80_vm0, %v299_v7 }
  0x16   :  { %268 = vmatmul.mubr.msk.bf16.gmra.mxu0 %vm80_vm0, %v299_v7  ;;  %286 = vmatmul.mubr.msk.bf16.gmra.mxu1 %vm80_vm0, %v296_v4 }
  0xc6   :  { %v127_v15 = vpop.f32.mrf.mxu0  ;;  %v157_v16 = vpop.f32.mrf.mxu1 }
  0xc7   :  { %v128_v17 = vadd.f32 %v127_v15, %v353_v13  ;;  %v158_v18 = vadd.f32 %v157_v16, %v353_v13 }
  0xc8   :  { %v129_v20 = vpop.f32.mrf.mxu0  ;;  %v159_v21 = vpop.f32.mrf.mxu1 }
  0xc9   :  { %231 = vst [vmem:[%s448_s3] sm:$0xff] %v128_v17  ;;  %249 = vst [vmem:[%s448_s3 + $0x90] sm:$0xff] %v158_v18  ;;  %v130_v22 = vadd.f32 %v129_v20, %v355_v14  ;;  %v160_v23 = vadd.f32 %v159_v21, %v355_v14 }
  0xca   :  { %v131_v24 = vpop.f32.mrf.mxu0  ;;  %v161_v25 = vpop.f32.mrf.mxu1 }
  0xcb   :  { %232 = vst [vmem:[%s448_s3 + $0x8] sm:$0xff] %v130_v22  ;;  %250 = vst [vmem:[%s448_s3 + $0x98] sm:$0xff] %v160_v23  ;;  %v132_v26 = vadd.f32 %v131_v24, %v353_v13  ;;  %v162_v27 = vadd.f32 %v161_v25, %v353_v13 }
  0xcc   :  { %v133_v29 = vpop.f32.mrf.mxu0  ;;  %v163_v30 = vpop.f32.mrf.mxu1 }
  0xcd   :  { %234 = vst [vmem:[%s448_s3 + $0x18] sm:$0xff] %v132_v26  ;;  %252 = vst [vmem:[%s448_s3 + $0xa8] sm:$0xff] %v162_v27  ;;  %v134_v31 = vadd.f32 %v133_v29, %v355_v14  ;;  %v164_v32 = vadd.f32 %v163_v30, %v355_v14 }
  0xce   :  { %v137_v33 = vpop.f32.mrf.mxu0  ;;  %v283_v34 = vpop.f32.mrf.mxu1 }
  0xcf   :  { %235 = vst [vmem:[%s448_s3 + $0x20] sm:$0xff] %v134_v31  ;;  %253 = vst [vmem:[%s448_s3 + $0xb0] sm:$0xff] %v164_v32  ;;  %v138_v35 = vadd.f32 %v137_v33, %v353_v13  ;;  %v209_v36 = vadd.f32 %v283_v34, %v40_v28 }
  0xd0   :  { %v139_v37 = vpop.f32.mrf.mxu0  ;;  %v200_v38 = vpop.f32.mrf.mxu1 }
  0xd1   :  { %237 = vst [vmem:[%s448_s3 + $0x30] sm:$0xff] %v138_v35  ;;  %239 = vst [vmem:[%s448_s3 + $0x40] sm:$0xff] %v209_v36  ;;  %v140_v39 = vadd.f32 %v139_v37, %v355_v14  ;;  %v201_v40 = vadd.f32 %v200_v38, %v40_v28 }
  0xd2   :  { %v141_v41 = vpop.f32.mrf.mxu0  ;;  %v284_v42 = vpop.f32.mrf.mxu1 }
  0xd3   :  { %238 = vst [vmem:[%s448_s3 + $0x38] sm:$0xff] %v140_v39  ;;  %233 = vst [vmem:[%s448_s3 + $0x10] sm:$0xff] %v201_v40  ;;  %v142_v43 = vadd.f32 %v141_v41, %v353_v13  ;;  %v212_v44 = vadd.f32 %v284_v42, %v40_v28 }
  0xd4   :  { %v143_v45 = vpop.f32.mrf.mxu0  ;;  %v203_v46 = vpop.f32.mrf.mxu1 }
  0xd5   :  { %240 = vst [vmem:[%s448_s3 + $0x48] sm:$0xff] %v142_v43  ;;  %242 = vst [vmem:[%s448_s3 + $0x58] sm:$0xff] %v212_v44  ;;  %v144_v47 = vadd.f32 %v143_v45, %v355_v14  ;;  %v204_v48 = vadd.f32 %v203_v46, %v40_v28 }
  0xd6   :  { %v147_v49 = vpop.f32.mrf.mxu0  ;;  %v287_v50 = vpop.f32.mrf.mxu1 }
  0xd7   :  { %241 = vst [vmem:[%s448_s3 + $0x50] sm:$0xff] %v144_v47  ;;  %236 = vst [vmem:[%s448_s3 + $0x28] sm:$0xff] %v204_v48  ;;  %v148_v51 = vadd.f32 %v147_v49, %v353_v13  ;;  %v225_v52 = vadd.f32 %v287_v50, %v40_v28 }
  0xd8   :  { %v149_v53 = vpop.f32.mrf.mxu0  ;;  %v216_v54 = vpop.f32.mrf.mxu1 }
  0xd9   :  { %243 = vst [vmem:[%s448_s3 + $0x60] sm:$0xff] %v148_v51  ;;  %251 = vst [vmem:[%s448_s3 + $0xa0] sm:$0xff] %v225_v52  ;;  %v150_v55 = vadd.f32 %v149_v53, %v355_v14  ;;  %v217_v56 = vadd.f32 %v216_v54, %v40_v28 }
  0xda   :  { %v151_v57 = vpop.f32.mrf.mxu0  ;;  %v288_v58 = vpop.f32.mrf.mxu1 }
  0xdb   :  { %244 = vst [vmem:[%s448_s3 + $0x68] sm:$0xff] %v150_v55  ;;  %245 = vst [vmem:[%s448_s3 + $0x70] sm:$0xff] %v217_v56  ;;  %v152_v59 = vadd.f32 %v151_v57, %v353_v13  ;;  %v228_v60 = vadd.f32 %v288_v58, %v40_v28 }
  0xdc   :  { %v153_v61 = vpop.f32.mrf.mxu0  ;;  %v219_v62 = vpop.f32.mrf.mxu1 }
  0xdd   :  { %246 = vst [vmem:[%s448_s3 + $0x78] sm:$0xff] %v152_v59  ;;  %254 = vst [vmem:[%s448_s3 + $0xb8] sm:$0xff] %v228_v60  ;;  %v154_v63 = vadd.f32 %v153_v61, %v355_v14  ;;  %v220_v0 = vadd.f32 %v219_v62, %v40_v28 }
  0xdf   :  { %247 = vst [vmem:[%s448_s3 + $0x80] sm:$0xff] %v154_v63  ;;  %248 = vst [vmem:[%s448_s3 + $0x88] sm:$0xff] %v220_v0 }

// kernel: generator_forward.5
= control target key start
LH: loop header
LB: loop body
LE: loop exit
PB: predicated region body
PF: predicated region fallthrough
CT: control target
= control target key end

     0   :  { %s547_s1 = inlined_call_operand.vmem [shape: bf16[128,128], index: 1, kind: input, shape index: {}]   ;;  %s548_s0 = inlined_call_operand.vmem [shape: bf16[64,128], index: 0, kind: input, shape index: {}]   ;;  %s549_s2 = inlined_call_operand.vmem [shape: f32[1,128], index: 2, kind: input, shape index: {}]   ;;  %s550_s3 = inlined_call_operand.vmem [shape: f32[64,128], index: 3, kind: output, shape index: {}]  }
   0x1   :  { %v348_v0 = vld [vmem:[%s547_s1 + $0x38] sm:$0xff]   ;;  %v349_v1 = vld [vmem:[%s547_s1 + $0x30] sm:$0xff]   ;;  %v350_v2 = vld [vmem:[%s547_s1 + $0x28] sm:$0xff]  }
   0x2   :  { %308 = vmatprep.subr.bf16.mxu0 %v348_v0  ;;  %332 = vmatprep.subr.bf16.mxu1 %v348_v0  ;;  %v351_v3 = vld [vmem:[%s547_s1 + $0x20] sm:$0xff]   ;;  %v357_v5 = vld [vmem:[%s548_s0 + $0x10] sm:$0xff]   ;;  %v352_v6 = vld [vmem:[%s547_s1 + $0x18] sm:$0xff]  }
   0x3   :  { %309 = vmatpush3.bf16.msra.mxu0 %v348_v0  ;;  %340 = vmatpush3.bf16.msra.mxu1 %v348_v0  ;;  %v356_v4 = vld [vmem:[%s548_s0] sm:$0xff]   ;;  %v353_v7 = vld [vmem:[%s547_s1 + $0x10] sm:$0xff]   ;;  %v354_v8 = vld [vmem:[%s547_s1 + $0x8] sm:$0xff]  }
   0x4   :  { %310 = vmatprep.subr.bf16.mxu0 %v349_v1  ;;  %333 = vmatprep.subr.bf16.mxu1 %v349_v1  ;;  %v355_v9 = vld [vmem:[%s547_s1] sm:$0xff]   ;;  %v358_v10 = vld [vmem:[%s548_s0 + $0x8] sm:$0xff]   ;;  %v359_v11 = vld [vmem:[%s548_s0 + $0x18] sm:$0xff]  }
   0x5   :  { %324 = vmatprep.mubr.bf16.mxu0 %v356_v4  ;;  %328 = vmatprep.mubr.bf16.mxu1 %v357_v5  ;;  %v283_v12 = vld [vmem:[%s549_s2] ss:$0 sm:$0xff] }
   0x7   :  { %311 = vmatpush3.bf16.msra.mxu0 %v349_v1  ;;  %341 = vmatpush3.bf16.msra.mxu1 %v349_v1 }
   0x8   :  { %312 = vmatprep.subr.bf16.mxu0 %v350_v2  ;;  %334 = vmatprep.subr.bf16.mxu1 %v350_v2 }
   0xb   :  { %313 = vmatpush3.bf16.msra.mxu0 %v350_v2  ;;  %342 = vmatpush3.bf16.msra.mxu1 %v350_v2 }
   0xc   :  { %314 = vmatprep.subr.bf16.mxu0 %v351_v3  ;;  %335 = vmatprep.subr.bf16.mxu1 %v351_v3 }
   0xf   :  { %315 = vmatpush3.bf16.msra.mxu0 %v351_v3  ;;  %343 = vmatpush3.bf16.msra.mxu1 %v351_v3 }
  0x10   :  { %316 = vmatprep.subr.bf16.mxu0 %v352_v6  ;;  %336 = vmatprep.subr.bf16.mxu1 %v352_v6 }
  0x13   :  { %317 = vmatpush3.bf16.msra.mxu0 %v352_v6  ;;  %344 = vmatpush3.bf16.msra.mxu1 %v352_v6 }
  0x14   :  { %318 = vmatprep.subr.bf16.mxu0 %v353_v7  ;;  %337 = vmatprep.subr.bf16.mxu1 %v353_v7 }
  0x17   :  { %319 = vmatpush3.bf16.msra.mxu0 %v353_v7  ;;  %345 = vmatpush3.bf16.msra.mxu1 %v353_v7 }
  0x18   :  { %320 = vmatprep.subr.bf16.mxu0 %v354_v8  ;;  %338 = vmatprep.subr.bf16.mxu1 %v354_v8 }
  0x1b   :  { %321 = vmatpush3.bf16.msra.mxu0 %v354_v8  ;;  %346 = vmatpush3.bf16.msra.mxu1 %v354_v8 }
  0x1c   :  { %322 = vmatprep.subr.bf16.mxu0 %v355_v9  ;;  %339 = vmatprep.subr.bf16.mxu1 %v355_v9 }
  0x1f   :  { %323 = vmatpush3.bf16.msra.mxu0 %v355_v9  ;;  %347 = vmatpush3.bf16.msra.mxu1 %v355_v9 }
  0x22   :  { %325 = vmatmul.mubr.bf16.vlgmr.msra.gmra.mxu0 %v358_v10  ;;  %329 = vmatmul.mubr.bf16.vlgmr.msra.gmra.mxu1 %v359_v11 }
  0xe2   :  { %v326_v13 = vpop.f32.mrf.mxu0  ;;  %v330_v14 = vpop.f32.mrf.mxu1 }
  0xe3   :  { %v451_v15 = vadd.f32 %v326_v13, %v283_v12  ;;  %v471_v28 = vadd.f32 %v330_v14, %v283_v12 }
  0xe4   :  { %v152_v16 = vpop.f32.mrf.mxu0  ;;  %v168_v17 = vpop.f32.mrf.mxu1 }
  0xe5   :  { %v453_v18 = vadd.f32 %v283_v12, %v152_v16  ;;  %187 = vmax.xlane.f32.xlu1 %v451_v15  ;;  %v459_v23 = vadd.f32 %v283_v12, %v168_v17 }
  0xe6   :  { %v327_v19 = vpop.f32.mrf.mxu0  ;;  %v331_v20 = vpop.f32.mrf.mxu1 }
  0xe7   :  { %v456_v21 = vadd.f32 %v327_v19, %v283_v12  ;;  %183 = vmax.xlane.f32.xlu0 %v453_v18  ;;  %v468_v27 = vadd.f32 %v331_v20, %v283_v12 }
  0xe8   :  { %v171_v22 = vpop.f32.mrf.mxu1  ;;  %v155_v24 = vpop.f32.mrf.mxu0 }
  0xe9   :  { %189 = vmax.xlane.f32.xlu1 %v456_v21  ;;  %v462_v25 = vadd.f32 %v283_v12, %v171_v22  ;;  %v465_v26 = vadd.f32 %v283_v12, %v155_v24 }
  0xeb   :  { %191 = vmax.xlane.f32.xlu0 %v459_v23 }
  0xed   :  { %193 = vmax.xlane.f32.xlu1 %v462_v25 }
  0xef   :  { %185 = vmax.xlane.f32.xlu0 %v465_v26 }
  0xf1   :  { %197 = vmax.xlane.f32.xlu1 %v468_v27 }
  0xf3   :  { %195 = vmax.xlane.f32.xlu0 %v471_v28 }
 0x16e   :  { %v475_v29 = vpop.xlane.xlu1 %187 }
 0x16f   :  { %v201_v30 = vsub.f32 %v451_v15, %v475_v29 }
 0x170   :  { %v479_v31 = vpop.xlane.xlu0 %183 }
 0x171   :  { %v211_v32 = vmul.f32 1.442695, %v201_v30  ;;  %v199_v33 = vsub.f32 %v453_v18, %v479_v31 }
 0x172   :  { %v483_v34 = vpop.xlane.xlu1 %189 }
 0x173   :  { %360 = vpow2.f32 %v211_v32  ;;  %v207_v35 = vmul.f32 1.442695, %v199_v33  ;;  %v202_v36 = vsub.f32 %v456_v21, %v483_v34 }
 0x174   :  { %v487_v37 = vpop.xlane.xlu0 %191 }
 0x175   :  { %v213_v38 = vmul.f32 1.442695, %v202_v36  ;;  %v203_v39 = vsub.f32 %v459_v23, %v487_v37  ;;  %362 = vpow2.f32 %v207_v35 }
 0x176   :  { %v491_v40 = vpop.xlane.xlu1 %193 }
 0x177   :  { %364 = vpow2.f32 %v213_v38  ;;  %v215_v41 = vmul.f32 1.442695, %v203_v39  ;;  %v204_v42 = vsub.f32 %v462_v25, %v491_v40 }
 0x178   :  { %v495_v43 = vpop.xlane.xlu0 %185 }
 0x179   :  { %v200_v44 = vsub.f32 %v465_v26, %v495_v43  ;;  %366 = vpow2.f32 %v215_v41  ;;  %v217_v47 = vmul.f32 1.442695, %v204_v42 }
 0x17a   :  { %v499_v45 = vpop.xlane.xlu1 %197 }
 0x17b   :  { %v209_v46 = vmul.f32 1.442695, %v200_v44  ;;  %v206_v49 = vsub.f32 %v468_v27, %v499_v45 }
 0x17c   :  { %v501_v48 = vpop.xlane.xlu0 %195 }
 0x17d   :  { %368 = vpow2.f32 %v209_v46  ;;  %v205_v50 = vsub.f32 %v471_v28, %v501_v48  ;;  %v221_v53 = vmul.f32 1.442695, %v206_v49 }
 0x17e   :  { %370 = vpow2.f32 %v217_v47 }
 0x17f   :  { %v219_v51 = vmul.f32 1.442695, %v205_v50 }
 0x180   :  { %v361_v52 = vpop.eup %360 }
 0x181   :  { %372 = vpow2.f32 %v219_v51  ;;  %227 = vadd.xlane.f32.xlu0 %v361_v52 }
 0x182   :  { %v363_v54 = vpop.eup %362  ;;  %374 = vpow2.f32 %v221_v53 }
 0x184   :  { %v365_v55 = vpop.eup %364 }
 0x185   :  { %229 = vadd.xlane.f32.xlu1 %v365_v55  ;;  %223 = vadd.xlane.f32.xlu0 %v363_v54 }
 0x186   :  { %v367_v56 = vpop.eup %366 }
 0x189   :  { %231 = vadd.xlane.f32.xlu0 %v367_v56 }
 0x18a   :  { %v369_v57 = vpop.eup %368 }
 0x18b   :  { %225 = vadd.xlane.f32.xlu1 %v369_v57  ;;  %v371_v58 = vpop.eup %370 }
 0x18e   :  { %v373_v59 = vpop.eup %372 }
 0x18f   :  { %233 = vadd.xlane.f32.xlu1 %v371_v58  ;;  %235 = vadd.xlane.f32.xlu0 %v373_v59  ;;  %v375_v60 = vpop.eup %374 }
 0x193   :  { %237 = vadd.xlane.f32.xlu1 %v375_v60 }
 0x20a   :  { %v228_v61 = vpop.xlane.xlu0 %227 }
 0x20b   :  { %376 = vlog2.f32 %v228_v61 }
 0x20e   :  { %v230_v62 = vpop.xlane.xlu1 %229  ;;  %v224_v63 = vpop.xlane.xlu0 %223 }
 0x20f   :  { %378 = vlog2.f32 %v230_v62 }
 0x210   :  { %380 = vlog2.f32 %v224_v63 }
 0x212   :  { %v232_v0 = vpop.xlane.xlu0 %231 }
 0x213   :  { %382 = vlog2.f32 %v232_v0 }
 0x214   :  { %v226_v1 = vpop.xlane.xlu1 %225 }
 0x215   :  { %384 = vlog2.f32 %v226_v1 }
 0x218   :  { %v377_v2 = vpop.eup %376  ;;  %v234_v3 = vpop.xlane.xlu1 %233 }
 0x219   :  { %v236_v4 = vpop.xlane.xlu0 %235  ;;  %v244_v5 = vmul.f32 0.6931472, %v377_v2  ;;  %386 = vlog2.f32 %v234_v3 }
 0x21a   :  { %388 = vlog2.f32 %v236_v4 }
 0x21b   :  { %v257_v6 = vadd.f32 %v244_v5, %v475_v29 }
 0x21c   :  { %v379_v7 = vpop.eup %378  ;;  %v238_v8 = vpop.xlane.xlu1 %237 }
 0x21d   :  { %v381_v9 = vpop.eup %380  ;;  %v265_v10 = vsub.f32 %v451_v15, %v257_v6  ;;  %v246_v11 = vmul.f32 0.6931472, %v379_v7  ;;  %390 = vlog2.f32 %v238_v8 }
 0x21e   :  { %v240_v12 = vmul.f32 0.6931472, %v381_v9 }
 0x21f   :  { %273 = vst [vmem:[%s550_s3 + $0x10] sm:$0xff] %v265_v10  ;;  %v258_v13 = vadd.f32 %v246_v11, %v483_v34 }
 0x220   :  { %v383_v14 = vpop.eup %382  ;;  %v255_v16 = vadd.f32 %v240_v12, %v479_v31 }
 0x221   :  { %v266_v17 = vsub.f32 %v456_v21, %v258_v13  ;;  %v248_v19 = vmul.f32 0.6931472, %v383_v14 }
 0x222   :  { %v385_v20 = vpop.eup %384  ;;  %v263_v22 = vsub.f32 %v453_v18, %v255_v16 }
 0x223   :  { %274 = vst [vmem:[%s550_s3 + $0x18] sm:$0xff] %v266_v17  ;;  %v259_v15 = vadd.f32 %v248_v19, %v487_v37  ;;  %v242_v24 = vmul.f32 0.6931472, %v385_v20 }
 0x224   :  { %271 = vst [vmem:[%s550_s3] sm:$0xff] %v263_v22 }
 0x225   :  { %v267_v29 = vsub.f32 %v459_v23, %v259_v15  ;;  %v256_v30 = vadd.f32 %v242_v24, %v495_v43 }
 0x226   :  { %v387_v21 = vpop.eup %386 }
 0x227   :  { %v389_v31 = vpop.eup %388  ;;  %275 = vst [vmem:[%s550_s3 + $0x20] sm:$0xff] %v267_v29  ;;  %v264_v18 = vsub.f32 %v465_v26, %v256_v30  ;;  %v250_v32 = vmul.f32 0.6931472, %v387_v21 }
 0x228   :  { %v252_v33 = vmul.f32 0.6931472, %v389_v31 }
 0x229   :  { %272 = vst [vmem:[%s550_s3 + $0x8] sm:$0xff] %v264_v18  ;;  %v260_v34 = vadd.f32 %v250_v32, %v491_v40 }
 0x22a   :  { %v391_v35 = vpop.eup %390  ;;  %v261_v23 = vadd.f32 %v252_v33, %v501_v48 }
 0x22b   :  { %v268_v36 = vsub.f32 %v462_v25, %v260_v34  ;;  %v254_v37 = vmul.f32 0.6931472, %v391_v35 }
 0x22c   :  { %v269_v38 = vsub.f32 %v471_v28, %v261_v23 }
 0x22d   :  { %276 = vst [vmem:[%s550_s3 + $0x28] sm:$0xff] %v268_v36  ;;  %v262_v26 = vadd.f32 %v254_v37, %v499_v45 }
 0x22e   :  { %277 = vst [vmem:[%s550_s3 + $0x30] sm:$0xff] %v269_v38 }
 0x22f   :  { %v270_v39 = vsub.f32 %v468_v27, %v262_v26 }
 0x231   :  { %278 = vst [vmem:[%s550_s3 + $0x38] sm:$0xff] %v270_v39 }

// kernel: generator_forward.4
= control target key start
LH: loop header
LB: loop body
LE: loop exit
PB: predicated region body
PF: predicated region fallthrough
CT: control target
= control target key end

     0   :  { %v1505_v1 = vmov 0.0   ;;  %v1506_v2 = vmov 0   ;;  %vm1507_vm0 = vmmov 0   ;;  %s2102_s1 = inlined_call_operand.vmem [shape: bf16[128,384], index: 1, kind: input, shape index: {}]   ;;  %s2103_s3 = inlined_call_operand.vmem [shape: f32[8,128], index: 3, kind: input, shape index: {}]   ;;  %s2104_s0 = inlined_call_operand.vmem [shape: f32[8,8,384], index: 0, kind: input, shape index: {}]   ;;  %s2105_s2 = inlined_call_operand.vmem [shape: f32[1,128], index: 2, kind: input, shape index: {}]   ;;  %s2106_s4 = inlined_call_operand.vmem [shape: bf16[8,8,128], index: 4, kind: output, shape index: {0}]   ;;  %s2107_s5 = inlined_call_operand.vmem [shape: f32[8,128], index: 5, kind: output, shape index: {1}]  }
   0x1   :  { %v1541_v0 = vld [vmem:[%s2102_s1 + $0xac] ss:$12 sps:$4 sm:$0xff]   ;;  %1223 = vmatprep.subr.bf16.mxu1 %v1505_v1  ;;  %224 = vmatprep.mubr.bf16.mxu0 %v1506_v2  ;;  %v1548_v3 = vld [vmem:[%s2102_s1 + $0xa8] ss:$12 sps:$4 sm:$0xff]   ;;  %v1562_v5 = vld [vmem:[%s2102_s1 + $0x90] ss:$12 sps:$4 sm:$0xff]  }
   0x2   :  { %1239 = vmatprep.mubr.msk.bf16.mxu1 %vm1507_vm0, %v1505_v1  ;;  %192 = vmatprep.subr.bf16.mxu0 %v1541_v0  ;;  %v1556_v4 = vld [vmem:[%s2102_s1 + $0x94] ss:$12 sps:$4 sm:$0xff]   ;;  %v1568_v6 = vld [vmem:[%s2102_s1 + $0x7c] ss:$12 sps:$4 sm:$0xff]   ;;  %v1574_v7 = vld [vmem:[%s2102_s1 + $0x78] ss:$12 sps:$4 sm:$0xff]  }
   0x3   :  { %193 = vmatpush1.bf16.msra.mxu0 %v1548_v3  ;;  %v1580_v8 = vld [vmem:[%s2102_s1 + $0x64] ss:$12 sps:$4 sm:$0xff]   ;;  %v1591_v10 = vld [vmem:[%s2102_s1 + $0x60] ss:$12 sps:$4 sm:$0xff]   ;;  %v1609_v13 = vld [vmem:[%s2102_s1 + $0x48] ss:$12 sps:$4 sm:$0xff]  }
   0x4   :  { %194 = vmatprep.subr.bf16.mxu0 %v1556_v4  ;;  %v1585_v9 = vld [vmem:[%s2102_s1 + $0xb0] ss:$12 sps:$4 sm:$0xff]   ;;  %v1597_v11 = vld [vmem:[%s2102_s1 + $0x4c] ss:$12 sps:$4 sm:$0xff]   ;;  %v1615_v14 = vld [vmem:[%s2102_s1 + $0x34] ss:$12 sps:$4 sm:$0xff]  }
   0x5   :  { %1224 = vmatpush3.bf16.msra.mxu1 %v1585_v9  ;;  %v1603_v12 = vld [vmem:[%s2102_s1 + $0x98] ss:$12 sps:$4 sm:$0xff]   ;;  %v1622_v15 = vld [vmem:[%s2102_s1 + $0x80] ss:$12 sps:$4 sm:$0xff]   ;;  %v1629_v16 = vld [vmem:[%s2102_s1 + $0x30] ss:$12 sps:$4 sm:$0xff]  }
   0x6   :  { %1225 = vmatprep.subr.bf16.mxu1 %v1505_v1  ;;  %v1635_v17 = vld [vmem:[%s2102_s1 + $0x1c] ss:$12 sps:$4 sm:$0xff]   ;;  %v1648_v19 = vld [vmem:[%s2102_s1 + $0x18] ss:$12 sps:$4 sm:$0xff]   ;;  %v1667_v22 = vld [vmem:[%s2102_s1] ss:$12 sps:$4 sm:$0xff]  }
   0x7   :  { %195 = vmatpush1.bf16.msra.mxu0 %v1562_v5  ;;  %v1641_v18 = vld [vmem:[%s2102_s1 + $0x68] ss:$12 sps:$4 sm:$0xff]   ;;  %v1654_v20 = vld [vmem:[%s2102_s1 + $0x4] ss:$12 sps:$4 sm:$0xff]   ;;  %v1689_v26 = vld [vmem:[%s2102_s1 + $0x20] ss:$12 sps:$4 sm:$0xff]  }
   0x8   :  { %196 = vmatprep.subr.bf16.mxu0 %v1568_v6  ;;  %v1660_v21 = vld [vmem:[%s2102_s1 + $0x50] ss:$12 sps:$4 sm:$0xff]   ;;  %v1672_v23 = vld [vmem:[%s2103_s3] sm:$0xff]  ;;  %v1699_v27 = vld [vmem:[%s2102_s1 + $0x8] ss:$12 sps:$4 sm:$0xff]  }
   0x9   :  { %1226 = vmatpush3.bf16.msra.mxu1 %v1603_v12  ;;  %v1679_v24 = vld [vmem:[%s2102_s1 + $0x38] ss:$12 sps:$4 sm:$0xff]   ;;  %v63_v25 = vpack.c.bf16 %v1672_v23, %v1672_v23  ;;  %v61_v33 = vld [vmem:[%s2104_s0 + $0x8] sm:$0xff]  ;;  %v1746_v45 = vld [vmem:[%s2105_s2] ss:$0 sm:$0xff] }
   0xa   :  { %1227 = vmatprep.subr.bf16.mxu1 %v1505_v1  ;;  %v60_v28 = vld [vmem:[%s2104_s0] sm:$0xff]  ;;  %v62_v49 = vld [vmem:[%s2104_s0 + $0x10] sm:$0xff]  ;;  %v1109_v59 = vld [vmem:[%s2104_s0 + $0x18] sm:$0xff] }
   0xb   :  { %197 = vmatpush1.bf16.msra.mxu0 %v1574_v7 }
   0xc   :  { %198 = vmatprep.subr.bf16.mxu0 %v1580_v8 }
   0xd   :  { %1228 = vmatpush3.bf16.msra.mxu1 %v1622_v15 }
   0xe   :  { %1229 = vmatprep.subr.bf16.mxu1 %v1505_v1 }
   0xf   :  { %199 = vmatpush1.bf16.msra.mxu0 %v1591_v10 }
  0x10   :  { %200 = vmatprep.subr.bf16.mxu0 %v1597_v11 }
  0x11   :  { %1230 = vmatpush3.bf16.msra.mxu1 %v1641_v18 }
  0x12   :  { %1231 = vmatprep.subr.bf16.mxu1 %v1505_v1 }
  0x13   :  { %201 = vmatpush1.bf16.msra.mxu0 %v1609_v13 }
  0x14   :  { %202 = vmatprep.subr.bf16.mxu0 %v1615_v14 }
  0x15   :  { %1232 = vmatpush3.bf16.msra.mxu1 %v1660_v21 }
  0x16   :  { %1233 = vmatprep.subr.bf16.mxu1 %v1505_v1 }
  0x17   :  { %203 = vmatpush1.bf16.msra.mxu0 %v1629_v16 }
  0x18   :  { %204 = vmatprep.subr.bf16.mxu0 %v1635_v17 }
  0x19   :  { %1234 = vmatpush3.bf16.msra.mxu1 %v1679_v24 }
  0x1a   :  { %1235 = vmatprep.subr.bf16.mxu1 %v1505_v1 }
  0x1b   :  { %205 = vmatpush1.bf16.msra.mxu0 %v1648_v19 }
  0x1c   :  { %206 = vmatprep.subr.bf16.mxu0 %v1654_v20 }
  0x1d   :  { %1236 = vmatpush3.bf16.msra.mxu1 %v1689_v26 }
  0x1e   :  { %1237 = vmatprep.subr.bf16.mxu1 %v1505_v1 }
  0x1f   :  { %207 = vmatpush1.bf16.msra.mxu0 %v1667_v22 }
  0x20   :  { %307 = vmatprep.subr.bf16.mxu0 %v1541_v0 }
  0x21   :  { %1238 = vmatpush3.bf16.msra.mxu1 %v1699_v27 }
  0x22   :  { %225 = vmatmul.mubr.bf16.vlgmr.msra.gmra.mxu0 %v63_v25  ;;  %1243 = vmatprep.subr.bf16.mxu1 %v1505_v1 }
  0x23   :  { %308 = vmatpush1.bf16.msra.mxu0 %v1548_v3  ;;  %339 = vmatprep.mubr.bf16.mxu0 %v1506_v2 }
  0x24   :  { %309 = vmatprep.subr.bf16.mxu0 %v1556_v4  ;;  %1240 = vmatmul.mubr.bf16.vlgmr.msra.gmra.mxu1 %v63_v25 }
  0x25   :  { %1244 = vmatpush3.bf16.msra.mxu1 %v1585_v9  ;;  %1259 = vmatprep.mubr.msk.bf16.mxu1 %vm1507_vm0, %v1505_v1 }
  0x26   :  { %1245 = vmatprep.subr.bf16.mxu1 %v1505_v1 }
  0x27   :  { %310 = vmatpush1.bf16.msra.mxu0 %v1562_v5 }
  0x28   :  { %311 = vmatprep.subr.bf16.mxu0 %v1568_v6 }
  0x29   :  { %1246 = vmatpush3.bf16.msra.mxu1 %v1603_v12 }
  0x2a   :  { %1247 = vmatprep.subr.bf16.mxu1 %v1505_v1 }
  0x2b   :  { %312 = vmatpush1.bf16.msra.mxu0 %v1574_v7 }
  0x2c   :  { %313 = vmatprep.subr.bf16.mxu0 %v1580_v8 }
  0x2d   :  { %1248 = vmatpush3.bf16.msra.mxu1 %v1622_v15 }
  0x2e   :  { %1249 = vmatprep.subr.bf16.mxu1 %v1505_v1 }
  0x2f   :  { %314 = vmatpush1.bf16.msra.mxu0 %v1591_v10 }
  0x30   :  { %315 = vmatprep.subr.bf16.mxu0 %v1597_v11 }
  0x31   :  { %1250 = vmatpush3.bf16.msra.mxu1 %v1641_v18 }
  0x32   :  { %1251 = vmatprep.subr.bf16.mxu1 %v1505_v1 }
  0x33   :  { %316 = vmatpush1.bf16.msra.mxu0 %v1609_v13 }
  0x34   :  { %317 = vmatprep.subr.bf16.mxu0 %v1615_v14 }
  0x35   :  { %1252 = vmatpush3.bf16.msra.mxu1 %v1660_v21 }
  0x36   :  { %1253 = vmatprep.subr.bf16.mxu1 %v1505_v1 }
  0x37   :  { %318 = vmatpush1.bf16.msra.mxu0 %v1629_v16 }
  0x38   :  { %319 = vmatprep.subr.bf16.mxu0 %v1635_v17 }
  0x39   :  { %1254 = vmatpush3.bf16.msra.mxu1 %v1679_v24 }
  0x3a   :  { %1255 = vmatprep.subr.bf16.mxu1 %v1505_v1 }
  0x3b   :  { %320 = vmatpush1.bf16.msra.mxu0 %v1648_v19 }
  0x3c   :  { %321 = vmatprep.subr.bf16.mxu0 %v1654_v20 }
  0x3d   :  { %1256 = vmatpush3.bf16.msra.mxu1 %v1689_v26 }
  0x3e   :  { %1257 = vmatprep.subr.bf16.mxu1 %v1505_v1 }
  0x3f   :  { %322 = vmatpush1.bf16.msra.mxu0 %v1667_v22 }
  0x40   :  { %417 = vmatprep.subr.bf16.mxu0 %v1541_v0 }
  0x41   :  { %1258 = vmatpush3.bf16.msra.mxu1 %v1699_v27 }
  0x42   :  { %1263 = vmatprep.subr.bf16.mxu1 %v1505_v1 }
  0xe2   :  { %v226_v29 = vpop.f32.mrf.mxu0 }
  0xe3   :  { %v273_v30 = vadd.f32 %v226_v29, %v60_v28  ;;  %v1110_v28 = vld [vmem:[%s2104_s0 + $0x20] sm:$0xff] }
  0xe4   :  { %v228_v31 = vpop.f32.mrf.mxu0  ;;  %v267_v37 = vpop.f32.mrf.mxu1 }
  0xe5   :  { %v1106_v32 = vmul.f32 -1.442695, %v273_v30  ;;  %v280_v36 = vadd.f32 %v228_v31, %v61_v33  ;;  %v293_v47 = vadd.f32 %v1746_v45, %v267_v37 }
  0xe6   :  { %v230_v34 = vpop.f32.mrf.mxu0  ;;  %v1241_v39 = vpop.f32.mrf.mxu1 }
  0xe7   :  { %1418 = vpow2.f32 %v1106_v32  ;;  %v1107_v38 = vmul.f32 -1.442695, %v280_v36 }
  0xe8   :  { %v231_v35 = vpop.f32.mrf.mxu0  ;;  %v270_v40 = vpop.f32.mrf.mxu1 }
  0xe9   :  { %1420 = vpow2.f32 %v1107_v38 }
  0xea   :  { %v1242_v41 = vpop.f32.mrf.mxu1 }
  0xeb   :  { %v1111_v41 = vld [vmem:[%s2104_s0 + $0x28] sm:$0xff] }
  0xf4   :  { %v1419_v42 = vpop.eup %1418 }
  0xf5   :  { %v277_v43 = vadd.f32 1.0, %v1419_v42 }
  0xf6   :  { %v1421_v44 = vpop.eup %1420 }
  0xf7   :  { %1422 = vrcp.f32 %v277_v43  ;;  %v284_v46 = vadd.f32 1.0, %v1421_v44 }
  0xf9   :  { %1424 = vrcp.f32 %v284_v46 }
 0x104   :  { %v1423_v48 = vpop.eup %1422 }
 0x105   :  { %v294_v50 = vmul.f32 %v1423_v48, %v293_v47 }
 0x106   :  { %v1425_v52 = vpop.eup %1424 }
 0x107   :  { %v295_v51 = vadd.f32 %v294_v50, %v62_v49  ;;  %v297_v53 = vsub.f32 1.0, %v1425_v52  ;;  %v299_v56 = vmul.f32 %v1425_v52, %v1672_v23  ;;  %v1115_v52 = vld [vmem:[%s2104_s0 + $0x30] sm:$0xff] }
 0x109   :  { %1426 = vtanh.f32 %v295_v51 }
 0x116   :  { %v1427_v54 = vpop.eup %1426 }
 0x117   :  { %v298_v55 = vmul.f32 %v1427_v54, %v297_v53 }
 0x119   :  { %v1753_v57 = vadd.f32 %v299_v56, %v298_v55 }
 0x11b   :  { %v301_v58 = vpack.c.bf16 %v1753_v57, %v1753_v57 }
 0x11d   :  { %302 = vst [vmem:[%s2106_s4] sm:$0xf] %v301_v58  ;;  %340 = vmatmul.mubr.bf16.vlgmr.msra.gmra.mxu0 %v301_v58  ;;  %1260 = vmatmul.mubr.bf16.vlgmr.msra.gmra.mxu1 %v301_v58 }
 0x11e   :  { %418 = vmatpush1.bf16.msra.mxu0 %v1548_v3  ;;  %1264 = vmatpush3.bf16.msra.mxu1 %v1585_v9 }
 0x11f   :  { %419 = vmatprep.subr.bf16.mxu0 %v1556_v4  ;;  %1265 = vmatprep.subr.bf16.mxu1 %v1505_v1 }
 0x120   :  { %449 = vmatprep.mubr.bf16.mxu0 %v1506_v2  ;;  %1279 = vmatprep.mubr.msk.bf16.mxu1 %vm1507_vm0, %v1505_v1 }
 0x122   :  { %420 = vmatpush1.bf16.msra.mxu0 %v1562_v5  ;;  %1266 = vmatpush3.bf16.msra.mxu1 %v1603_v12 }
 0x123   :  { %421 = vmatprep.subr.bf16.mxu0 %v1568_v6  ;;  %1267 = vmatprep.subr.bf16.mxu1 %v1505_v1 }
 0x126   :  { %422 = vmatpush1.bf16.msra.mxu0 %v1574_v7  ;;  %1268 = vmatpush3.bf16.msra.mxu1 %v1622_v15 }
 0x127   :  { %423 = vmatprep.subr.bf16.mxu0 %v1580_v8  ;;  %1269 = vmatprep.subr.bf16.mxu1 %v1505_v1 }
 0x12a   :  { %424 = vmatpush1.bf16.msra.mxu0 %v1591_v10  ;;  %1270 = vmatpush3.bf16.msra.mxu1 %v1641_v18 }
 0x12b   :  { %425 = vmatprep.subr.bf16.mxu0 %v1597_v11  ;;  %1271 = vmatprep.subr.bf16.mxu1 %v1505_v1 }
 0x12e   :  { %426 = vmatpush1.bf16.msra.mxu0 %v1609_v13  ;;  %1272 = vmatpush3.bf16.msra.mxu1 %v1660_v21 }
 0x12f   :  { %427 = vmatprep.subr.bf16.mxu0 %v1615_v14  ;;  %1273 = vmatprep.subr.bf16.mxu1 %v1505_v1 }
 0x132   :  { %428 = vmatpush1.bf16.msra.mxu0 %v1629_v16  ;;  %1274 = vmatpush3.bf16.msra.mxu1 %v1679_v24 }
 0x133   :  { %429 = vmatprep.subr.bf16.mxu0 %v1635_v17  ;;  %1275 = vmatprep.subr.bf16.mxu1 %v1505_v1 }
 0x136   :  { %430 = vmatpush1.bf16.msra.mxu0 %v1648_v19  ;;  %1276 = vmatpush3.bf16.msra.mxu1 %v1689_v26 }
 0x137   :  { %431 = vmatprep.subr.bf16.mxu0 %v1654_v20  ;;  %1277 = vmatprep.subr.bf16.mxu1 %v1505_v1 }
 0x13a   :  { %432 = vmatpush1.bf16.msra.mxu0 %v1667_v22  ;;  %1278 = vmatpush3.bf16.msra.mxu1 %v1699_v27 }
 0x13b   :  { %527 = vmatprep.subr.bf16.mxu0 %v1541_v0  ;;  %1283 = vmatprep.subr.bf16.mxu1 %v1505_v1 }
 0x1dd   :  { %v341_v60 = vpop.f32.mrf.mxu0  ;;  %v382_v61 = vpop.f32.mrf.mxu1 }
 0x1de   :  { %v388_v62 = vadd.f32 %v1109_v59, %v341_v60  ;;  %v402_v39 = vadd.f32 %v1746_v45, %v382_v61  ;;  %v1116_v59 = vld [vmem:[%s2104_s0 + $0x38] sm:$0xff] }
 0x1df   :  { %v343_v63 = vpop.f32.mrf.mxu0  ;;  %v1261_v23 = vpop.f32.mrf.mxu1 }
 0x1e0   :  { %v1112_v25 = vmul.f32 -1.442695, %v388_v62  ;;  %v395_v33 = vadd.f32 %v1110_v28, %v343_v63 }
 0x1e1   :  { %v345_v29 = vpop.f32.mrf.mxu0  ;;  %v385_v30 = vpop.f32.mrf.mxu1 }
 0x1e2   :  { %1428 = vpow2.f32 %v1112_v25  ;;  %v1113_v34 = vmul.f32 -1.442695, %v395_v33 }
 0x1e3   :  { %v346_v31 = vpop.f32.mrf.mxu0  ;;  %v1262_v32 = vpop.f32.mrf.mxu1 }
 0x1e4   :  { %1430 = vpow2.f32 %v1113_v34  ;;  %v1117_v34 = vld [vmem:[%s2104_s0 + $0x40] sm:$0xff] }
 0x1ef   :  { %v1429_v35 = vpop.eup %1428 }
 0x1f0   :  { %v392_v36 = vadd.f32 1.0, %v1429_v35 }
 0x1f1   :  { %v1431_v37 = vpop.eup %1430 }
 0x1f2   :  { %1432 = vrcp.f32 %v392_v36  ;;  %v399_v38 = vadd.f32 1.0, %v1431_v37 }
 0x1f4   :  { %1434 = vrcp.f32 %v399_v38 }
 0x1ff   :  { %v1433_v40 = vpop.eup %1432 }
 0x200   :  { %v403_v42 = vmul.f32 %v1433_v40, %v402_v39 }
 0x201   :  { %v1435_v44 = vpop.eup %1434 }
 0x202   :  { %v404_v43 = vadd.f32 %v1111_v41, %v403_v42  ;;  %v406_v46 = vsub.f32 1.0, %v1435_v44  ;;  %v408_v49 = vmul.f32 %v1435_v44, %v1753_v57  ;;  %v1121_v44 = vld [vmem:[%s2104_s0 + $0x48] sm:$0xff] }
 0x204   :  { %1436 = vtanh.f32 %v404_v43 }
 0x211   :  { %v1437_v47 = vpop.eup %1436 }
 0x212   :  { %v407_v48 = vmul.f32 %v1437_v47, %v406_v46 }
 0x214   :  { %v1806_v50 = vadd.f32 %v408_v49, %v407_v48 }
 0x216   :  { %v410_v51 = vpack.c.bf16 %v1806_v50, %v1806_v50 }
 0x218   :  { %1114 = vst [vmem:[%s2106_s4 + $0x4] sm:$0xf] %v410_v51  ;;  %450 = vmatmul.mubr.bf16.vlgmr.msra.gmra.mxu0 %v410_v51  ;;  %1280 = vmatmul.mubr.bf16.vlgmr.msra.gmra.mxu1 %v410_v51 }
 0x219   :  { %528 = vmatpush1.bf16.msra.mxu0 %v1548_v3  ;;  %1284 = vmatpush3.bf16.msra.mxu1 %v1585_v9 }
 0x21a   :  { %529 = vmatprep.subr.bf16.mxu0 %v1556_v4  ;;  %1285 = vmatprep.subr.bf16.mxu1 %v1505_v1 }
 0x21b   :  { %559 = vmatprep.mubr.bf16.mxu0 %v1506_v2  ;;  %1299 = vmatprep.mubr.msk.bf16.mxu1 %vm1507_vm0, %v1505_v1 }
 0x21d   :  { %530 = vmatpush1.bf16.msra.mxu0 %v1562_v5  ;;  %1286 = vmatpush3.bf16.msra.mxu1 %v1603_v12 }
 0x21e   :  { %531 = vmatprep.subr.bf16.mxu0 %v1568_v6  ;;  %1287 = vmatprep.subr.bf16.mxu1 %v1505_v1 }
 0x221   :  { %532 = vmatpush1.bf16.msra.mxu0 %v1574_v7  ;;  %1288 = vmatpush3.bf16.msra.mxu1 %v1622_v15 }
 0x222   :  { %533 = vmatprep.subr.bf16.mxu0 %v1580_v8  ;;  %1289 = vmatprep.subr.bf16.mxu1 %v1505_v1 }
 0x225   :  { %534 = vmatpush1.bf16.msra.mxu0 %v1591_v10  ;;  %1290 = vmatpush3.bf16.msra.mxu1 %v1641_v18 }
 0x226   :  { %535 = vmatprep.subr.bf16.mxu0 %v1597_v11  ;;  %1291 = vmatprep.subr.bf16.mxu1 %v1505_v1 }
 0x229   :  { %536 = vmatpush1.bf16.msra.mxu0 %v1609_v13  ;;  %1292 = vmatpush3.bf16.msra.mxu1 %v1660_v21 }
 0x22a   :  { %537 = vmatprep.subr.bf16.mxu0 %v1615_v14  ;;  %1293 = vmatprep.subr.bf16.mxu1 %v1505_v1 }
 0x22d   :  { %538 = vmatpush1.bf16.msra.mxu0 %v1629_v16  ;;  %1294 = vmatpush3.bf16.msra.mxu1 %v1679_v24 }
 0x22e   :  { %539 = vmatprep.subr.bf16.mxu0 %v1635_v17  ;;  %1295 = vmatprep.subr.bf16.mxu1 %v1505_v1 }
 0x231   :  { %540 = vmatpush1.bf16.msra.mxu0 %v1648_v19  ;;  %1296 = vmatpush3.bf16.msra.mxu1 %v1689_v26 }
 0x232   :  { %541 = vmatprep.subr.bf16.mxu0 %v1654_v20  ;;  %1297 = vmatprep.subr.bf16.mxu1 %v1505_v1 }
 0x235   :  { %542 = vmatpush1.bf16.msra.mxu0 %v1667_v22  ;;  %1298 = vmatpush3.bf16.msra.mxu1 %v1699_v27 }
 0x236   :  { %637 = vmatprep.subr.bf16.mxu0 %v1541_v0  ;;  %1303 = vmatprep.subr.bf16.mxu1 %v1505_v1 }
 0x2d8   :  { %v451_v53 = vpop.f32.mrf.mxu0  ;;  %v492_v54 = vpop.f32.mrf.mxu1 }
 0x2d9   :  { %v498_v55 = vadd.f32 %v1115_v52, %v451_v53  ;;  %v512_v32 = vadd.f32 %v1746_v45, %v492_v54  ;;  %v1122_v52 = vld [vmem:[%s2104_s0 + $0x50] sm:$0xff] }
 0x2da   :  { %v453_v56 = vpop.f32.mrf.mxu0  ;;  %v1281_v57 = vpop.f32.mrf.mxu1 }
 0x2db   :  { %v1118_v58 = vmul.f32 -1.442695, %v498_v55  ;;  %v505_v23 = vadd.f32 %v1116_v59, %v453_v56 }
 0x2dc   :  { %v455_v60 = vpop.f32.mrf.mxu0  ;;  %v495_v61 = vpop.f32.mrf.mxu1 }
 0x2dd   :  { %1438 = vpow2.f32 %v1118_v58  ;;  %v1119_v25 = vmul.f32 -1.442695, %v505_v23 }
 0x2de   :  { %v456_v62 = vpop.f32.mrf.mxu0  ;;  %v1282_v63 = vpop.f32.mrf.mxu1 }
 0x2df   :  { %1440 = vpow2.f32 %v1119_v25  ;;  %v1123_v25 = vld [vmem:[%s2104_s0 + $0x58] sm:$0xff] }
 0x2ea   :  { %v1439_v28 = vpop.eup %1438 }
 0x2eb   :  { %v502_v29 = vadd.f32 1.0, %v1439_v28 }
 0x2ec   :  { %v1441_v30 = vpop.eup %1440 }
 0x2ed   :  { %1442 = vrcp.f32 %v502_v29  ;;  %v509_v31 = vadd.f32 1.0, %v1441_v30 }
 0x2ef   :  { %1444 = vrcp.f32 %v509_v31 }
 0x2fa   :  { %v1443_v33 = vpop.eup %1442 }
 0x2fb   :  { %v513_v35 = vmul.f32 %v1443_v33, %v512_v32 }
 0x2fc   :  { %v1445_v37 = vpop.eup %1444 }
 0x2fd   :  { %v514_v36 = vadd.f32 %v1117_v34, %v513_v35  ;;  %v516_v38 = vsub.f32 1.0, %v1445_v37  ;;  %v518_v41 = vmul.f32 %v1445_v37, %v1806_v50  ;;  %v1127_v37 = vld [vmem:[%s2104_s0 + $0x60] sm:$0xff] }
 0x2ff   :  { %1446 = vtanh.f32 %v514_v36 }
 0x30c   :  { %v1447_v39 = vpop.eup %1446 }
 0x30d   :  { %v517_v40 = vmul.f32 %v1447_v39, %v516_v38 }
 0x30f   :  { %v1859_v42 = vadd.f32 %v518_v41, %v517_v40 }
 0x311   :  { %v520_v43 = vpack.c.bf16 %v1859_v42, %v1859_v42 }
 0x313   :  { %1120 = vst [vmem:[%s2106_s4 + $0x8] sm:$0xf] %v520_v43  ;;  %560 = vmatmul.mubr.bf16.vlgmr.msra.gmra.mxu0 %v520_v43  ;;  %1300 = vmatmul.mubr.bf16.vlgmr.msra.gmra.mxu1 %v520_v43 }
 0x314   :  { %638 = vmatpush1.bf16.msra.mxu0 %v1548_v3  ;;  %1304 = vmatpush3.bf16.msra.mxu1 %v1585_v9 }
 0x315   :  { %639 = vmatprep.subr.bf16.mxu0 %v1556_v4  ;;  %1305 = vmatprep.subr.bf16.mxu1 %v1505_v1 }
 0x316   :  { %669 = vmatprep.mubr.bf16.mxu0 %v1506_v2  ;;  %1319 = vmatprep.mubr.msk.bf16.mxu1 %vm1507_vm0, %v1505_v1 }
 0x318   :  { %640 = vmatpush1.bf16.msra.mxu0 %v1562_v5  ;;  %1306 = vmatpush3.bf16.msra.mxu1 %v1603_v12 }
 0x319   :  { %641 = vmatprep.subr.bf16.mxu0 %v1568_v6  ;;  %1307 = vmatprep.subr.bf16.mxu1 %v1505_v1 }
 0x31c   :  { %642 = vmatpush1.bf16.msra.mxu0 %v1574_v7  ;;  %1308 = vmatpush3.bf16.msra.mxu1 %v1622_v15 }
 0x31d   :  { %643 = vmatprep.subr.bf16.mxu0 %v1580_v8  ;;  %1309 = vmatprep.subr.bf16.mxu1 %v1505_v1 }
 0x320   :  { %644 = vmatpush1.bf16.msra.mxu0 %v1591_v10  ;;  %1310 = vmatpush3.bf16.msra.mxu1 %v1641_v18 }
 0x321   :  { %645 = vmatprep.subr.bf16.mxu0 %v1597_v11  ;;  %1311 = vmatprep.subr.bf16.mxu1 %v1505_v1 }
 0x324   :  { %646 = vmatpush1.bf16.msra.mxu0 %v1609_v13  ;;  %1312 = vmatpush3.bf16.msra.mxu1 %v1660_v21 }
 0x325   :  { %647 = vmatprep.subr.bf16.mxu0 %v1615_v14  ;;  %1313 = vmatprep.subr.bf16.mxu1 %v1505_v1 }
 0x328   :  { %648 = vmatpush1.bf16.msra.mxu0 %v1629_v16  ;;  %1314 = vmatpush3.bf16.msra.mxu1 %v1679_v24 }
 0x329   :  { %649 = vmatprep.subr.bf16.mxu0 %v1635_v17  ;;  %1315 = vmatprep.subr.bf16.mxu1 %v1505_v1 }
 0x32c   :  { %650 = vmatpush1.bf16.msra.mxu0 %v1648_v19  ;;  %1316 = vmatpush3.bf16.msra.mxu1 %v1689_v26 }
 0x32d   :  { %651 = vmatprep.subr.bf16.mxu0 %v1654_v20  ;;  %1317 = vmatprep.subr.bf16.mxu1 %v1505_v1 }
 0x330   :  { %652 = vmatpush1.bf16.msra.mxu0 %v1667_v22  ;;  %1318 = vmatpush3.bf16.msra.mxu1 %v1699_v27 }
 0x331   :  { %747 = vmatprep.subr.bf16.mxu0 %v1541_v0  ;;  %1323 = vmatprep.subr.bf16.mxu1 %v1505_v1 }
 0x3d3   :  { %v561_v46 = vpop.f32.mrf.mxu0  ;;  %v602_v47 = vpop.f32.mrf.mxu1 }
 0x3d4   :  { %v608_v48 = vadd.f32 %v1121_v44, %v561_v46  ;;  %v622_v63 = vadd.f32 %v1746_v45, %v602_v47  ;;  %v1128_v44 = vld [vmem:[%s2104_s0 + $0x68] sm:$0xff] }
 0x3d5   :  { %v563_v49 = vpop.f32.mrf.mxu0  ;;  %v1301_v50 = vpop.f32.mrf.mxu1 }
 0x3d6   :  { %v1124_v51 = vmul.f32 -1.442695, %v608_v48  ;;  %v615_v57 = vadd.f32 %v1122_v52, %v563_v49 }
 0x3d7   :  { %v565_v53 = vpop.f32.mrf.mxu0  ;;  %v605_v54 = vpop.f32.mrf.mxu1 }
 0x3d8   :  { %1448 = vpow2.f32 %v1124_v51  ;;  %v1125_v58 = vmul.f32 -1.442695, %v615_v57 }
 0x3d9   :  { %v566_v55 = vpop.f32.mrf.mxu0  ;;  %v1302_v56 = vpop.f32.mrf.mxu1 }
 0x3da   :  { %1450 = vpow2.f32 %v1125_v58  ;;  %v1129_v58 = vld [vmem:[%s2104_s0 + $0x70] sm:$0xff] }
 0x3e5   :  { %v1449_v59 = vpop.eup %1448 }
 0x3e6   :  { %v612_v60 = vadd.f32 1.0, %v1449_v59 }
 0x3e7   :  { %v1451_v61 = vpop.eup %1450 }
 0x3e8   :  { %1452 = vrcp.f32 %v612_v60  ;;  %v619_v62 = vadd.f32 1.0, %v1451_v61 }
 0x3ea   :  { %1454 = vrcp.f32 %v619_v62 }
 0x3f5   :  { %v1453_v23 = vpop.eup %1452 }
 0x3f6   :  { %v623_v28 = vmul.f32 %v1453_v23, %v622_v63 }
 0x3f7   :  { %v1455_v30 = vpop.eup %1454 }
 0x3f8   :  { %v624_v29 = vadd.f32 %v1123_v25, %v623_v28  ;;  %v626_v31 = vsub.f32 1.0, %v1455_v30  ;;  %v628_v34 = vmul.f32 %v1455_v30, %v1859_v42  ;;  %v1134_v30 = vld [vmem:[%s2104_s0 + $0x80] sm:$0xff] }
 0x3fa   :  { %1456 = vtanh.f32 %v624_v29 }
 0x407   :  { %v1457_v32 = vpop.eup %1456 }
 0x408   :  { %v627_v33 = vmul.f32 %v1457_v32, %v626_v31 }
 0x40a   :  { %v1912_v35 = vadd.f32 %v628_v34, %v627_v33 }
 0x40c   :  { %v630_v36 = vpack.c.bf16 %v1912_v35, %v1912_v35 }
 0x40e   :  { %1126 = vst [vmem:[%s2106_s4 + $0xc] sm:$0xf] %v630_v36  ;;  %670 = vmatmul.mubr.bf16.vlgmr.msra.gmra.mxu0 %v630_v36  ;;  %1320 = vmatmul.mubr.bf16.vlgmr.msra.gmra.mxu1 %v630_v36 }
 0x40f   :  { %748 = vmatpush1.bf16.msra.mxu0 %v1548_v3  ;;  %1324 = vmatpush3.bf16.msra.mxu1 %v1585_v9 }
 0x410   :  { %749 = vmatprep.subr.bf16.mxu0 %v1556_v4  ;;  %1325 = vmatprep.subr.bf16.mxu1 %v1505_v1 }
 0x411   :  { %779 = vmatprep.mubr.bf16.mxu0 %v1506_v2  ;;  %1339 = vmatprep.mubr.msk.bf16.mxu1 %vm1507_vm0, %v1505_v1 }
 0x413   :  { %750 = vmatpush1.bf16.msra.mxu0 %v1562_v5  ;;  %1326 = vmatpush3.bf16.msra.mxu1 %v1603_v12 }
 0x414   :  { %751 = vmatprep.subr.bf16.mxu0 %v1568_v6  ;;  %1327 = vmatprep.subr.bf16.mxu1 %v1505_v1 }
 0x417   :  { %752 = vmatpush1.bf16.msra.mxu0 %v1574_v7  ;;  %1328 = vmatpush3.bf16.msra.mxu1 %v1622_v15 }
 0x418   :  { %753 = vmatprep.subr.bf16.mxu0 %v1580_v8  ;;  %1329 = vmatprep.subr.bf16.mxu1 %v1505_v1 }
 0x41b   :  { %754 = vmatpush1.bf16.msra.mxu0 %v1591_v10  ;;  %1330 = vmatpush3.bf16.msra.mxu1 %v1641_v18 }
 0x41c   :  { %755 = vmatprep.subr.bf16.mxu0 %v1597_v11  ;;  %1331 = vmatprep.subr.bf16.mxu1 %v1505_v1 }
 0x41f   :  { %756 = vmatpush1.bf16.msra.mxu0 %v1609_v13  ;;  %1332 = vmatpush3.bf16.msra.mxu1 %v1660_v21 }
 0x420   :  { %757 = vmatprep.subr.bf16.mxu0 %v1615_v14  ;;  %1333 = vmatprep.subr.bf16.mxu1 %v1505_v1 }
 0x423   :  { %758 = vmatpush1.bf16.msra.mxu0 %v1629_v16  ;;  %1334 = vmatpush3.bf16.msra.mxu1 %v1679_v24 }
 0x424   :  { %759 = vmatprep.subr.bf16.mxu0 %v1635_v17  ;;  %1335 = vmatprep.subr.bf16.mxu1 %v1505_v1 }
 0x427   :  { %760 = vmatpush1.bf16.msra.mxu0 %v1648_v19  ;;  %1336 = vmatpush3.bf16.msra.mxu1 %v1689_v26 }
 0x428   :  { %761 = vmatprep.subr.bf16.mxu0 %v1654_v20  ;;  %1337 = vmatprep.subr.bf16.mxu1 %v1505_v1 }
 0x42b   :  { %762 = vmatpush1.bf16.msra.mxu0 %v1667_v22  ;;  %1338 = vmatpush3.bf16.msra.mxu1 %v1699_v27 }
 0x42c   :  { %857 = vmatprep.subr.bf16.mxu0 %v1541_v0  ;;  %1343 = vmatprep.subr.bf16.mxu1 %v1505_v1 }
 0x4ce   :  { %v671_v38 = vpop.f32.mrf.mxu0  ;;  %v712_v39 = vpop.f32.mrf.mxu1 }
 0x4cf   :  { %v718_v40 = vadd.f32 %v1127_v37, %v671_v38  ;;  %v732_v56 = vadd.f32 %v1746_v45, %v712_v39 }
 0x4d0   :  { %v673_v41 = vpop.f32.mrf.mxu0  ;;  %v1321_v42 = vpop.f32.mrf.mxu1 }
 0x4d1   :  { %v1130_v43 = vmul.f32 -1.442695, %v718_v40  ;;  %v725_v50 = vadd.f32 %v1128_v44, %v673_v41  ;;  %v1135_v42 = vld [vmem:[%s2104_s0 + $0x88] sm:$0xff] }
 0x4d2   :  { %v675_v46 = vpop.f32.mrf.mxu0  ;;  %v715_v47 = vpop.f32.mrf.mxu1 }
 0x4d3   :  { %1458 = vpow2.f32 %v1130_v43  ;;  %v1131_v51 = vmul.f32 -1.442695, %v725_v50 }
 0x4d4   :  { %v676_v48 = vpop.f32.mrf.mxu0  ;;  %v1322_v49 = vpop.f32.mrf.mxu1 }
 0x4d5   :  { %1460 = vpow2.f32 %v1131_v51 }
 0x4e0   :  { %v1459_v52 = vpop.eup %1458 }
 0x4e1   :  { %v722_v53 = vadd.f32 1.0, %v1459_v52 }
 0x4e2   :  { %v1461_v54 = vpop.eup %1460 }
 0x4e3   :  { %1462 = vrcp.f32 %v722_v53  ;;  %v729_v55 = vadd.f32 1.0, %v1461_v54  ;;  %v1498_v53 = vld [vmem:[%s2102_s1 + $0xa8] ss:$12 sps:$4 sm:$0xff]  }
 0x4e4   :  { %v1499_v54 = vld [vmem:[%s2102_s1 + $0x94] ss:$12 sps:$4 sm:$0xff]  }
 0x4e5   :  { %1464 = vrcp.f32 %v729_v55  ;;  %v1500_v55 = vld [vmem:[%s2102_s1 + $0x90] ss:$12 sps:$4 sm:$0xff]  }
 0x4f0   :  { %v1463_v57 = vpop.eup %1462 }
 0x4f1   :  { %v733_v59 = vmul.f32 %v1463_v57, %v732_v56  ;;  %v1503_v56 = vld [vmem:[%s2102_s1 + $0x64] ss:$12 sps:$4 sm:$0xff]  }
 0x4f2   :  { %v1465_v61 = vpop.eup %1464 }
 0x4f3   :  { %v734_v60 = vadd.f32 %v1129_v58, %v733_v59  ;;  %v736_v62 = vsub.f32 1.0, %v1465_v61  ;;  %v738_v25 = vmul.f32 %v1465_v61, %v1912_v35 }
 0x4f5   :  { %1466 = vtanh.f32 %v734_v60 }
 0x502   :  { %v1467_v63 = vpop.eup %1466 }
 0x503   :  { %v737_v23 = vmul.f32 %v1467_v63, %v736_v62  ;;  %v1141_v62 = vld [vmem:[%s2104_s0 + $0xa0] sm:$0xff] }
 0x505   :  { %v1965_v28 = vadd.f32 %v738_v25, %v737_v23 }
 0x507   :  { %v740_v29 = vpack.c.bf16 %v1965_v28, %v1965_v28 }
 0x509   :  { %1132 = vst [vmem:[%s2106_s4 + $0x10] sm:$0xf] %v740_v29  ;;  %780 = vmatmul.mubr.bf16.vlgmr.msra.gmra.mxu0 %v740_v29  ;;  %1340 = vmatmul.mubr.bf16.vlgmr.msra.gmra.mxu1 %v740_v29 }
 0x50a   :  { %858 = vmatpush1.bf16.msra.mxu0 %v1548_v3  ;;  %1344 = vmatpush3.bf16.msra.mxu1 %v1585_v9  ;;  %v1133_v3 = vld [vmem:[%s2104_s0 + $0x78] sm:$0xff] }
 0x50b   :  { %859 = vmatprep.subr.bf16.mxu0 %v1556_v4  ;;  %1345 = vmatprep.subr.bf16.mxu1 %v1505_v1 }
 0x50c   :  { %889 = vmatprep.mubr.bf16.mxu0 %v1506_v2  ;;  %1359 = vmatprep.mubr.msk.bf16.mxu1 %vm1507_vm0, %v1505_v1 }
 0x50e   :  { %860 = vmatpush1.bf16.msra.mxu0 %v1562_v5  ;;  %1346 = vmatpush3.bf16.msra.mxu1 %v1603_v12 }
 0x50f   :  { %861 = vmatprep.subr.bf16.mxu0 %v1568_v6  ;;  %1347 = vmatprep.subr.bf16.mxu1 %v1505_v1 }
 0x512   :  { %862 = vmatpush1.bf16.msra.mxu0 %v1574_v7  ;;  %1348 = vmatpush3.bf16.msra.mxu1 %v1622_v15 }
 0x513   :  { %863 = vmatprep.subr.bf16.mxu0 %v1580_v8  ;;  %1349 = vmatprep.subr.bf16.mxu1 %v1505_v1 }
 0x516   :  { %864 = vmatpush1.bf16.msra.mxu0 %v1591_v10  ;;  %1350 = vmatpush3.bf16.msra.mxu1 %v1641_v18 }
 0x517   :  { %865 = vmatprep.subr.bf16.mxu0 %v1597_v11  ;;  %1351 = vmatprep.subr.bf16.mxu1 %v1505_v1 }
 0x51a   :  { %866 = vmatpush1.bf16.msra.mxu0 %v1609_v13  ;;  %1352 = vmatpush3.bf16.msra.mxu1 %v1660_v21 }
 0x51b   :  { %867 = vmatprep.subr.bf16.mxu0 %v1615_v14  ;;  %1353 = vmatprep.subr.bf16.mxu1 %v1505_v1 }
 0x51e   :  { %868 = vmatpush1.bf16.msra.mxu0 %v1629_v16  ;;  %1354 = vmatpush3.bf16.msra.mxu1 %v1679_v24 }
 0x51f   :  { %869 = vmatprep.subr.bf16.mxu0 %v1635_v17  ;;  %1355 = vmatprep.subr.bf16.mxu1 %v1505_v1 }
 0x522   :  { %870 = vmatpush1.bf16.msra.mxu0 %v1648_v19  ;;  %1356 = vmatpush3.bf16.msra.mxu1 %v1689_v26 }
 0x523   :  { %871 = vmatprep.subr.bf16.mxu0 %v1654_v20  ;;  %1357 = vmatprep.subr.bf16.mxu1 %v1505_v1 }
 0x526   :  { %872 = vmatpush1.bf16.msra.mxu0 %v1667_v22  ;;  %1358 = vmatpush3.bf16.msra.mxu1 %v1699_v27 }
 0x527   :  { %967 = vmatprep.subr.bf16.mxu0 %v1541_v0  ;;  %1363 = vmatprep.subr.bf16.mxu1 %v1505_v1 }
 0x5c9   :  { %v781_v4 = vpop.f32.mrf.mxu0  ;;  %v822_v5 = vpop.f32.mrf.mxu1 }
 0x5ca   :  { %v828_v6 = vadd.f32 %v1133_v3, %v781_v4  ;;  %v842_v40 = vadd.f32 %v1746_v45, %v822_v5 }
 0x5cb   :  { %v783_v7 = vpop.f32.mrf.mxu0  ;;  %v1341_v8 = vpop.f32.mrf.mxu1 }
 0x5cc   :  { %v1136_v10 = vmul.f32 -1.442695, %v828_v6  ;;  %v835_v34 = vadd.f32 %v1134_v30, %v783_v7  ;;  %v1145_v7 = vld [vmem:[%s2104_s0 + $0xa8] sm:$0xff] }
 0x5cd   :  { %v785_v31 = vpop.f32.mrf.mxu0  ;;  %v825_v32 = vpop.f32.mrf.mxu1 }
 0x5ce   :  { %1468 = vpow2.f32 %v1136_v10  ;;  %v1137_v35 = vmul.f32 -1.442695, %v835_v34 }
 0x5cf   :  { %v786_v0 = vpop.f32.mrf.mxu0  ;;  %v1342_v33 = vpop.f32.mrf.mxu1 }
 0x5d0   :  { %1470 = vpow2.f32 %v1137_v35  ;;  %v1146_v33 = vld [vmem:[%s2104_s0 + $0xb0] sm:$0xff] }
 0x5db   :  { %v1469_v36 = vpop.eup %1468 }
 0x5dc   :  { %v832_v37 = vadd.f32 1.0, %v1469_v36 }
 0x5dd   :  { %v1471_v38 = vpop.eup %1470 }
 0x5de   :  { %1472 = vrcp.f32 %v832_v37  ;;  %v839_v39 = vadd.f32 1.0, %v1471_v38 }
 0x5e0   :  { %1474 = vrcp.f32 %v839_v39 }
 0x5eb   :  { %v1473_v41 = vpop.eup %1472 }
 0x5ec   :  { %v843_v43 = vmul.f32 %v1473_v41, %v842_v40 }
 0x5ed   :  { %v1475_v46 = vpop.eup %1474 }
 0x5ee   :  { %v844_v44 = vadd.f32 %v1135_v42, %v843_v43  ;;  %v846_v47 = vsub.f32 1.0, %v1475_v46  ;;  %v848_v50 = vmul.f32 %v1475_v46, %v1965_v28 }
 0x5f0   :  { %1476 = vtanh.f32 %v844_v44 }
 0x5fd   :  { %v1477_v48 = vpop.eup %1476 }
 0x5fe   :  { %v847_v49 = vmul.f32 %v1477_v48, %v846_v47  ;;  %v1147_v47 = vld [vmem:[%s2104_s0 + $0xb8] sm:$0xff] }
 0x600   :  { %v2018_v51 = vadd.f32 %v848_v50, %v847_v49 }
 0x602   :  { %v850_v52 = vpack.c.bf16 %v2018_v51, %v2018_v51 }
 0x604   :  { %1138 = vst [vmem:[%s2106_s4 + $0x14] sm:$0xf] %v850_v52  ;;  %890 = vmatmul.mubr.bf16.vlgmr.msra.gmra.mxu0 %v850_v52  ;;  %1360 = vmatmul.mubr.bf16.vlgmr.msra.gmra.mxu1 %v850_v52 }
 0x605   :  { %968 = vmatpush1.bf16.msra.mxu0 %v1498_v53  ;;  %1364 = vmatpush3.bf16.msra.mxu1 %v1585_v9  ;;  %v1501_v9 = vld [vmem:[%s2102_s1 + $0x7c] ss:$12 sps:$4 sm:$0xff]  }
 0x606   :  { %969 = vmatprep.subr.bf16.mxu0 %v1499_v54  ;;  %1365 = vmatprep.subr.bf16.mxu1 %v1505_v1 }
 0x607   :  { %999 = vmatprep.mubr.bf16.mxu0 %v1506_v2  ;;  %1379 = vmatprep.mubr.msk.bf16.mxu1 %vm1507_vm0, %v1505_v1  ;;  %v1502_v2 = vld [vmem:[%s2102_s1 + $0x78] ss:$12 sps:$4 sm:$0xff]  }
 0x609   :  { %970 = vmatpush1.bf16.msra.mxu0 %v1500_v55  ;;  %1366 = vmatpush3.bf16.msra.mxu1 %v1603_v12  ;;  %v1504_v12 = vld [vmem:[%s2102_s1 + $0x60] ss:$12 sps:$4 sm:$0xff]  }
 0x60a   :  { %971 = vmatprep.subr.bf16.mxu0 %v1501_v9  ;;  %1367 = vmatprep.subr.bf16.mxu1 %v1505_v1 }
 0x60d   :  { %972 = vmatpush1.bf16.msra.mxu0 %v1502_v2  ;;  %1368 = vmatpush3.bf16.msra.mxu1 %v1622_v15 }
 0x60e   :  { %973 = vmatprep.subr.bf16.mxu0 %v1503_v56  ;;  %1369 = vmatprep.subr.bf16.mxu1 %v1505_v1 }
 0x611   :  { %974 = vmatpush1.bf16.msra.mxu0 %v1504_v12  ;;  %1370 = vmatpush3.bf16.msra.mxu1 %v1641_v18 }
 0x612   :  { %975 = vmatprep.subr.bf16.mxu0 %v1597_v11  ;;  %1371 = vmatprep.subr.bf16.mxu1 %v1505_v1  ;;  %v1139_v11 = vld [vmem:[%s2104_s0 + $0x90] sm:$0xff] }
 0x615   :  { %976 = vmatpush1.bf16.msra.mxu0 %v1609_v13  ;;  %1372 = vmatpush3.bf16.msra.mxu1 %v1660_v21 }
 0x616   :  { %977 = vmatprep.subr.bf16.mxu0 %v1615_v14  ;;  %1373 = vmatprep.subr.bf16.mxu1 %v1505_v1 }
 0x619   :  { %978 = vmatpush1.bf16.msra.mxu0 %v1629_v16  ;;  %1374 = vmatpush3.bf16.msra.mxu1 %v1679_v24 }
 0x61a   :  { %979 = vmatprep.subr.bf16.mxu0 %v1635_v17  ;;  %1375 = vmatprep.subr.bf16.mxu1 %v1505_v1 }
 0x61d   :  { %980 = vmatpush1.bf16.msra.mxu0 %v1648_v19  ;;  %1376 = vmatpush3.bf16.msra.mxu1 %v1689_v26  ;;  %v1140_v19 = vld [vmem:[%s2104_s0 + $0x98] sm:$0xff] }
 0x61e   :  { %981 = vmatprep.subr.bf16.mxu0 %v1654_v20  ;;  %1377 = vmatprep.subr.bf16.mxu1 %v1505_v1 }
 0x621   :  { %982 = vmatpush1.bf16.msra.mxu0 %v1667_v22  ;;  %1378 = vmatpush3.bf16.msra.mxu1 %v1699_v27 }
 0x6c4   :  { %v891_v13 = vpop.f32.mrf.mxu0  ;;  %v932_v14 = vpop.f32.mrf.mxu1 }
 0x6c5   :  { %v938_v15 = vadd.f32 %v1139_v11, %v891_v13  ;;  %v952_v60 = vadd.f32 %v1746_v45, %v932_v14 }
 0x6c6   :  { %v893_v16 = vpop.f32.mrf.mxu0  ;;  %v1361_v17 = vpop.f32.mrf.mxu1 }
 0x6c7   :  { %v1142_v18 = vmul.f32 -1.442695, %v938_v15  ;;  %v945_v24 = vadd.f32 %v1140_v19, %v893_v16 }
 0x6c8   :  { %v895_v20 = vpop.f32.mrf.mxu0  ;;  %v935_v1 = vpop.f32.mrf.mxu1 }
 0x6c9   :  { %1478 = vpow2.f32 %v1142_v18  ;;  %v1143_v26 = vmul.f32 -1.442695, %v945_v24 }
 0x6ca   :  { %v896_v21 = vpop.f32.mrf.mxu0  ;;  %v1362_v22 = vpop.f32.mrf.mxu1 }
 0x6cb   :  { %1480 = vpow2.f32 %v1143_v26 }
 0x6d6   :  { %v1479_v27 = vpop.eup %1478 }
 0x6d7   :  { %v942_v57 = vadd.f32 1.0, %v1479_v27 }
 0x6d8   :  { %v1481_v58 = vpop.eup %1480 }
 0x6d9   :  { %1482 = vrcp.f32 %v942_v57  ;;  %v949_v59 = vadd.f32 1.0, %v1481_v58 }
 0x6db   :  { %1484 = vrcp.f32 %v949_v59 }
 0x6e6   :  { %v1483_v61 = vpop.eup %1482 }
 0x6e7   :  { %v953_v63 = vmul.f32 %v1483_v61, %v952_v60 }
 0x6e8   :  { %v1485_v25 = vpop.eup %1484 }
 0x6e9   :  { %v954_v23 = vadd.f32 %v1141_v62, %v953_v63  ;;  %v956_v28 = vsub.f32 1.0, %v1485_v25  ;;  %v958_v4 = vmul.f32 %v1485_v25, %v2018_v51 }
 0x6eb   :  { %1486 = vtanh.f32 %v954_v23 }
 0x6f8   :  { %v1487_v29 = vpop.eup %1486 }
 0x6f9   :  { %v957_v3 = vmul.f32 %v1487_v29, %v956_v28 }
 0x6fb   :  { %v959_v5 = vadd.f32 %v958_v4, %v957_v3 }
 0x6fd   :  { %v960_v6 = vpack.c.bf16 %v959_v5, %v959_v5 }
 0x6ff   :  { %1144 = vst [vmem:[%s2106_s4 + $0x18] sm:$0xf] %v960_v6  ;;  %1000 = vmatmul.mubr.bf16.vlgmr.msra.gmra.mxu0 %v960_v6  ;;  %1380 = vmatmul.mubr.bf16.vlgmr.msra.gmra.mxu1 %v960_v6 }
 0x7bf   :  { %v1001_v8 = vpop.f32.mrf.mxu0  ;;  %v1042_v10 = vpop.f32.mrf.mxu1 }
 0x7c0   :  { %v1048_v30 = vadd.f32 %v1145_v7, %v1001_v8  ;;  %v1062_v44 = vadd.f32 %v1746_v45, %v1042_v10 }
 0x7c1   :  { %v1003_v31 = vpop.f32.mrf.mxu0  ;;  %v1381_v32 = vpop.f32.mrf.mxu1 }
 0x7c2   :  { %v1148_v0 = vmul.f32 -1.442695, %v1048_v30  ;;  %v1055_v38 = vadd.f32 %v1146_v33, %v1003_v31 }
 0x7c3   :  { %v1005_v34 = vpop.f32.mrf.mxu0  ;;  %v1045_v35 = vpop.f32.mrf.mxu1 }
 0x7c4   :  { %1488 = vpow2.f32 %v1148_v0  ;;  %v1149_v39 = vmul.f32 -1.442695, %v1055_v38 }
 0x7c5   :  { %v1006_v36 = vpop.f32.mrf.mxu0  ;;  %v1382_v37 = vpop.f32.mrf.mxu1 }
 0x7c6   :  { %1490 = vpow2.f32 %v1149_v39 }
 0x7d1   :  { %v1489_v40 = vpop.eup %1488 }
 0x7d2   :  { %v1052_v41 = vadd.f32 1.0, %v1489_v40 }
 0x7d3   :  { %v1491_v42 = vpop.eup %1490 }
 0x7d4   :  { %1492 = vrcp.f32 %v1052_v41  ;;  %v1059_v43 = vadd.f32 1.0, %v1491_v42 }
 0x7d6   :  { %1494 = vrcp.f32 %v1059_v43 }
 0x7e1   :  { %v1493_v46 = vpop.eup %1492 }
 0x7e2   :  { %v1063_v48 = vmul.f32 %v1493_v46, %v1062_v44 }
 0x7e3   :  { %v1495_v50 = vpop.eup %1494 }
 0x7e4   :  { %v1064_v49 = vadd.f32 %v1147_v47, %v1063_v48  ;;  %v1066_v51 = vsub.f32 1.0, %v1495_v50  ;;  %v1068_v54 = vmul.f32 %v1495_v50, %v959_v5 }
 0x7e6   :  { %1496 = vtanh.f32 %v1064_v49 }
 0x7f3   :  { %v1497_v52 = vpop.eup %1496 }
 0x7f4   :  { %v1067_v53 = vmul.f32 %v1497_v52, %v1066_v51 }
 0x7f6   :  { %v1069_v55 = vadd.f32 %v1068_v54, %v1067_v53 }
 0x7f8   :  { %v1070_v9 = vpack.c.bf16 %v1069_v55, %v1069_v55  ;;  %1073 = vst [vmem:[%s2107_s5] sm:$0xff] %v1069_v55 }
 0x7fa   :  { %1150 = vst [vmem:[%s2106_s4 + $0x1c] sm:$0xf] %v1070_v9 }

</bundles_post_ra>
